<compile_context>
chip_gen: v6e
topology: v6e:2x2x1
jax: 0.10.0
libtpu: 0.0.40
codegen_flags: <defaults>
</compile_context>

<pallas_src>
import functools

import jax
import jax.numpy as jnp
from jax.experimental import pallas as pl
from jax.experimental.pallas import tpu as pltpu


VMEM_LIMIT = 32 * 1024 * 1024   # safe on v5e/v6e/v7x; raises v5e's 16 MiB default
_MHA_KEYS = ("wq", "bq", "wk", "bk", "wv", "bv", "wo", "bo")


# ----------------------------------------------------------------------------- in-kernel helpers

def _split_heads(x_bf, n_heads, head_dim):
    """(S, E) -> (H, S, d) via lane slices + leading-axis concat (no lane-splitting reshape)."""
    parts = [x_bf[:, h * head_dim:(h + 1) * head_dim][None, :, :] for h in range(n_heads)]
    return parts[0] if n_heads == 1 else jnp.concatenate(parts, axis=0)


def _merge_heads(o, n_heads):
    """(H, S, d) -> (S, H*d) via lane-dim concat."""
    parts = [o[h] for h in range(n_heads)]
    return parts[0] if n_heads == 1 else jnp.concatenate(parts, axis=-1)


def _attention(q, k, v, *, n_heads, head_dim, causal):
    """q, k, v: (S, E) float32. Returns (S, E) float32 (pre output-projection)."""
    s_q, s_k = q.shape[0], k.shape[0]
    qh = _split_heads(q.astype(jnp.bfloat16), n_heads, head_dim)   # (H, Sq, d)
    kh = _split_heads(k.astype(jnp.bfloat16), n_heads, head_dim)   # (H, Sk, d)
    vh = _split_heads(v.astype(jnp.bfloat16), n_heads, head_dim)   # (H, Sk, d)

    scale = 1.0 / (float(head_dim) ** 0.5)
    scores = jnp.einsum("hqd,hkd->hqk", qh, kh,
                        preferred_element_type=jnp.float32) * scale   # (H, Sq, Sk) f32
    if causal:
        row = jax.lax.broadcasted_iota(jnp.int32, (s_q, s_k), 0)
        col = jax.lax.broadcasted_iota(jnp.int32, (s_q, s_k), 1)
        scores = jnp.where((row >= col)[None, :, :], scores, jnp.float32(-1e30))

    scores = scores - jnp.max(scores, axis=-1, keepdims=True)
    p = jnp.exp(scores)
    p = p * pl.reciprocal(jnp.sum(p, axis=-1, keepdims=True), approx=True)

    o = jnp.einsum("hqk,hkd->hqd", p.astype(jnp.bfloat16), vh,
                   preferred_element_type=jnp.float32)                # (H, Sq, d) f32
    return _merge_heads(o, n_heads)                                   # (Sq, E) f32


def _layer_norm(z, gamma, beta, eps):
    mu = jnp.mean(z, axis=-1, keepdims=True)
    zc = z - mu
    var = jnp.mean(zc * zc, axis=-1, keepdims=True)
    return zc * jax.lax.rsqrt(var + eps) * gamma + beta


# ----------------------------------------------------------------------------- kernels

def _dec_attn_kernel(x_ref, enc_ref,
                     wqkv1_ref, bqkv1_ref, wo1_ref, bo1_ref, g1_ref, bt1_ref,
                     wq2_ref, bq2_ref, wkv2_ref, bkv2_ref, wo2_ref, bo2_ref,
                     g2_ref, bt2_ref,
                     out_ref,
                     *, n_heads, head_dim, eps):
    """out = AddNorm2(self_weighted, cross_MHA(q=enc, kv=AddNorm1(x, self_weighted)))."""
    E = n_heads * head_dim
    x = x_ref[0]                                   # (S, E) f32
    xb = x.astype(jnp.bfloat16)

    # ---- self-attention (causal), fused QKV projection -------------------------------------
    qkv = jnp.dot(xb, wqkv1_ref[...], preferred_element_type=jnp.float32) + bqkv1_ref[...]
    o = _attention(qkv[:, :E], qkv[:, E:2 * E], qkv[:, 2 * E:],
                   n_heads=n_heads, head_dim=head_dim, causal=True)
    weighted = jnp.dot(o.astype(jnp.bfloat16), wo1_ref[...],
                       preferred_element_type=jnp.float32) + bo1_ref[...]
    normed = _layer_norm(x + weighted, g1_ref[...], bt1_ref[...], eps)   # AddNorm1 (in VMEM only)

    # ---- cross-attention (no mask), fused KV projection -------------------------------------
    enc = enc_ref[0].astype(jnp.bfloat16)
    nb = normed.astype(jnp.bfloat16)
    q2 = jnp.dot(enc, wq2_ref[...], preferred_element_type=jnp.float32) + bq2_ref[...]
    kv2 = jnp.dot(nb, wkv2_ref[...], preferred_element_type=jnp.float32) + bkv2_ref[...]
    o2 = _attention(q2, kv2[:, :E], kv2[:, E:],
                    n_heads=n_heads, head_dim=head_dim, causal=False)
    mix = jnp.dot(o2.astype(jnp.bfloat16), wo2_ref[...],
                  preferred_element_type=jnp.float32) + bo2_ref[...]

    out_ref[0] = _layer_norm(weighted + mix, g2_ref[...], bt2_ref[...],
                             eps).astype(out_ref.dtype)                  # AddNorm2


def _self_attn_kernel(x_ref, wqkv_ref, bqkv_ref, wo_ref, bo_ref, out_ref,
                      *, n_heads, head_dim):
    """No-encoder path: out = self_MHA(x, x, x) (AddNorm1 result is dead downstream)."""
    E = n_heads * head_dim
    xb = x_ref[0].astype(jnp.bfloat16)
    qkv = jnp.dot(xb, wqkv_ref[...], preferred_element_type=jnp.float32) + bqkv_ref[...]
    o = _attention(qkv[:, :E], qkv[:, E:2 * E], qkv[:, 2 * E:],
                   n_heads=n_heads, head_dim=head_dim, causal=True)
    out_ref[0] = (jnp.dot(o.astype(jnp.bfloat16), wo_ref[...],
                          preferred_element_type=jnp.float32)
                  + bo_ref[...]).astype(out_ref.dtype)


def _ffn_addnorm_kernel(x_ref, w1_ref, b1_ref, w2_ref, b2_ref,
                        gamma_ref, beta_ref, out_ref, *, eps):
    """out = LayerNorm(x + W2 @ relu(W1 @ x)). Operates on a (rows, E) tile."""
    x = x_ref[...]                                 # (R, E) f32
    h = jnp.dot(x.astype(jnp.bfloat16), w1_ref[...],
                preferred_element_type=jnp.float32) + b1_ref[...]
    h = jnp.maximum(h, 0.0)
    y = jnp.dot(h.astype(jnp.bfloat16), w2_ref[...],
                preferred_element_type=jnp.float32) + b2_ref[...]
    out_ref[...] = _layer_norm(x + y, gamma_ref[...], beta_ref[...],
                               eps).astype(out_ref.dtype)


# ----------------------------------------------------------------------------- wrappers

def _weight_spec(shape):
    nd = len(shape)
    return pl.BlockSpec(tuple(shape), lambda *_, _nd=nd: (0,) * _nd)   # grid-invariant block


def _fuse_qkv(p):
    return (jnp.concatenate([p["wq"], p["wk"], p["wv"]], axis=1),      # (E, 3E) bf16
            jnp.concatenate([p["bq"], p["bk"], p["bv"]], axis=1))      # (1, 3E) f32


def _fuse_kv(p):
    return (jnp.concatenate([p["wk"], p["wv"]], axis=1),               # (E, 2E) bf16
            jnp.concatenate([p["bk"], p["bv"]], axis=1))               # (1, 2E) f32


def decoder_attention_block(inputs, encoder_inputs, p_self, p_ln1, p_cross, p_ln2,
                            *, n_heads, eps=1e-5):
    B, S, E = inputs.shape
    head_dim = E // n_heads
    act = pl.BlockSpec((1, S, E), lambda b: (b, 0, 0))
    wqkv1, bqkv1 = _fuse_qkv(p_self)
    wkv2, bkv2 = _fuse_kv(p_cross)
    params = [wqkv1, bqkv1, p_self["wo"], p_self["bo"], p_ln1["gamma"], p_ln1["beta"],
              p_cross["wq"], p_cross["bq"], wkv2, bkv2, p_cross["wo"], p_cross["bo"],
              p_ln2["gamma"], p_ln2["beta"]]
    kernel = functools.partial(_dec_attn_kernel, n_heads=n_heads, head_dim=head_dim, eps=eps)
    return pl.pallas_call(
        kernel,
        out_shape=jax.ShapeDtypeStruct((B, S, E), jnp.float32),
        grid=(B,),
        in_specs=[act, act] + [_weight_spec(p.shape) for p in params],
        out_specs=act,
        compiler_params=pltpu.CompilerParams(
            dimension_semantics=("parallel",), vmem_limit_bytes=VMEM_LIMIT),
    )(inputs, encoder_inputs, *params)


def self_attention_block(inputs, p_self, *, n_heads):
    B, S, E = inputs.shape
    head_dim = E // n_heads
    act = pl.BlockSpec((1, S, E), lambda b: (b, 0, 0))
    wqkv, bqkv = _fuse_qkv(p_self)
    params = [wqkv, bqkv, p_self["wo"], p_self["bo"]]
    kernel = functools.partial(_self_attn_kernel, n_heads=n_heads, head_dim=head_dim)
    return pl.pallas_call(
        kernel,
        out_shape=jax.ShapeDtypeStruct((B, S, E), jnp.float32),
        grid=(B,),
        in_specs=[act] + [_weight_spec(p.shape) for p in params],
        out_specs=act,
        compiler_params=pltpu.CompilerParams(
            dimension_semantics=("parallel",), vmem_limit_bytes=VMEM_LIMIT),
    )(inputs, *params)


def ffn_add_norm(x, p_ffn, p_ln, *, eps=1e-5):
    B, S, E = x.shape
    rows = B * S
    x2 = x.reshape(rows, E)                  # grid over flattened rows -> bigger matmul M
    tile_r = rows if rows <= 512 else 512
    if rows % tile_r:
        tile_r = rows
    act = pl.BlockSpec((tile_r, E), lambda r: (r, 0))
    kernel = functools.partial(_ffn_addnorm_kernel, eps=eps)
    params = [p_ffn[k] for k in ("w1", "b1", "w2", "b2")] + [p_ln["gamma"], p_ln["beta"]]
    out = pl.pallas_call(
        kernel,
        out_shape=jax.ShapeDtypeStruct((rows, E), jnp.float32),
        grid=(rows // tile_r,),
        in_specs=[act] + [_weight_spec(p.shape) for p in params],
        out_specs=act,
        compiler_params=pltpu.CompilerParams(
            dimension_semantics=("parallel",), vmem_limit_bytes=VMEM_LIMIT),
    )(x2, *params)
    return out.reshape(B, S, E)


# ----------------------------------------------------------------------------- module

def decoder_layer(inputs, encoder_inputs, params):
    """Mirrors DecoderLayer.forward (dropout == identity at inference)."""
    n_heads = params["n_heads"]
    if encoder_inputs is not None:
        # weighted     = input_mha(x, x, x)
        # inputs_norm  = first_add_norm(x, weighted)        (stays in VMEM)
        # enc_dec_mix  = encoder_mha(q=enc, k=inputs_norm, v=inputs_norm)
        # weighted     = second_add_norm(weighted, enc_dec_mix)
        weighted = decoder_attention_block(
            inputs, encoder_inputs,
            params["input_mha"], params["first_add_norm"],
            params["encoder_mha"], params["second_add_norm"],
            n_heads=n_heads)
    else:
        # first_add_norm output is unused downstream in this branch of the reference.
        weighted = self_attention_block(inputs, params["input_mha"], n_heads=n_heads)
    # weighted = third_add_norm(weighted, ffn(weighted))
    return ffn_add_norm(weighted, params["ffn"], params["third_add_norm"])


# ----------------------------------------------------------------------------- params

def _init_mha_params(key, emb_dim):
    ks = jax.random.split(key, 8)
    s = 1.0 / jnp.sqrt(jnp.float32(emb_dim))

    def w(k):
        return (jax.random.uniform(k, (emb_dim, emb_dim), jnp.float32, -1.0, 1.0)
                * s).astype(jnp.bfloat16)

    def b(k):
        return jax.random.uniform(k, (1, emb_dim), jnp.float32, -1.0, 1.0) * s

    return {"wq": w(ks[0]), "bq": b(ks[1]), "wk": w(ks[2]), "bk": b(ks[3]),
            "wv": w(ks[4]), "bv": b(ks[5]), "wo": w(ks[6]), "bo": b(ks[7])}


def _init_add_norm_params(emb_dim):
    return {"gamma": jnp.ones((1, emb_dim), jnp.float32),
            "beta": jnp.zeros((1, emb_dim), jnp.float32)}


def _init_ffn_params(key, emb_dim):
    hidden = 4 * emb_dim
    ks = jax.random.split(key, 4)
    s1 = 1.0 / jnp.sqrt(jnp.float32(emb_dim))
    s2 = 1.0 / jnp.sqrt(jnp.float32(hidden))
    return {
        "w1": (jax.random.uniform(ks[0], (emb_dim, hidden), jnp.float32, -1.0, 1.0)
               * s1).astype(jnp.bfloat16),
        "b1": jax.random.uniform(ks[1], (1, hidden), jnp.float32, -1.0, 1.0) * s1,
        "w2": (jax.random.uniform(ks[2], (hidden, emb_dim), jnp.float32, -1.0, 1.0)
               * s2).astype(jnp.bfloat16),
        "b2": jax.random.uniform(ks[3], (1, emb_dim), jnp.float32, -1.0, 1.0) * s2,
    }


def init_decoder_layer_params(key, emb_dim, n_heads):
    k1, k2, k3 = jax.random.split(key, 3)
    return {
        "n_heads": n_heads,
        "input_mha": _init_mha_params(k1, emb_dim),
        "first_add_norm": _init_add_norm_params(emb_dim),
        "encoder_mha": _init_mha_params(k2, emb_dim),
        "second_add_norm": _init_add_norm_params(emb_dim),
        "ffn": _init_ffn_params(k3, emb_dim),
        "third_add_norm": _init_add_norm_params(emb_dim),
    }


# ----------------------------------------------------------------------------- main

if __name__ == "__main__":
    B, S, E, H = 2, 8, 32, 4   # batch, seq_len, emb_dim, n_heads
    key = jax.random.PRNGKey(0)
    k_in, k_enc, k_par = jax.random.split(key, 3)

    inputs = jax.random.normal(k_in, (B, S, E), jnp.float32)
    encoder_inputs = jax.random.normal(k_enc, (B, S, E), jnp.float32)
    params = init_decoder_layer_params(k_par, E, H)

    out = decoder_layer(inputs, encoder_inputs, params)
    out = jax.block_until_ready(out)
    assert out.shape == (B, S, E) and out.dtype == jnp.float32
    assert bool(jnp.all(jnp.isfinite(out)))

    # Exercise the encoder_inputs=None branch as well.
    out_no_enc = jax.block_until_ready(decoder_layer(inputs, None, params))
    assert out_no_enc.shape == (B, S, E)
    assert bool(jnp.all(jnp.isfinite(out_no_enc)))

    print("KERNEL_OK")
</pallas_src>

<mosaic_0001>
module attributes {stable_mosaic.version = 11 : i64} {
  func.func @_dec_attn_kernel(%arg0: i32, %arg1: memref<1x8x32xf32, #tpu.memory_space<vmem>>, %arg2: memref<1x8x32xf32, #tpu.memory_space<vmem>>, %arg3: memref<32x96xbf16, #tpu.memory_space<vmem>>, %arg4: memref<1x96xf32, #tpu.memory_space<vmem>>, %arg5: memref<32x32xbf16, #tpu.memory_space<vmem>>, %arg6: memref<1x32xf32, #tpu.memory_space<vmem>>, %arg7: memref<1x32xf32, #tpu.memory_space<vmem>>, %arg8: memref<1x32xf32, #tpu.memory_space<vmem>>, %arg9: memref<32x32xbf16, #tpu.memory_space<vmem>>, %arg10: memref<1x32xf32, #tpu.memory_space<vmem>>, %arg11: memref<32x64xbf16, #tpu.memory_space<vmem>>, %arg12: memref<1x64xf32, #tpu.memory_space<vmem>>, %arg13: memref<32x32xbf16, #tpu.memory_space<vmem>>, %arg14: memref<1x32xf32, #tpu.memory_space<vmem>>, %arg15: memref<1x32xf32, #tpu.memory_space<vmem>>, %arg16: memref<1x32xf32, #tpu.memory_space<vmem>>, %arg17: memref<1x8x32xf32, #tpu.memory_space<vmem>>) attributes {dimension_semantics = [#tpu.dimension_semantics<parallel>], iteration_bounds = array<i64: 2>, scalar_prefetch = 0 : i64, scratch_operands = 0 : i64, tpu.core_type = #tpu.core_type<tc>, window_params = [{transform_indices = @transform_0, window_bounds = array<i64: 1, 8, 32>}, {transform_indices = @transform_1, window_bounds = array<i64: 1, 8, 32>}, {pipeline_mode = #tpu.pipeline_mode<synchronous>, transform_indices = @transform_2, window_bounds = array<i64: 32, 96>}, {pipeline_mode = #tpu.pipeline_mode<synchronous>, transform_indices = @transform_3, window_bounds = array<i64: 1, 96>}, {pipeline_mode = #tpu.pipeline_mode<synchronous>, transform_indices = @transform_4, window_bounds = array<i64: 32, 32>}, {pipeline_mode = #tpu.pipeline_mode<synchronous>, transform_indices = @transform_5, window_bounds = array<i64: 1, 32>}, {pipeline_mode = #tpu.pipeline_mode<synchronous>, transform_indices = @transform_6, window_bounds = array<i64: 1, 32>}, {pipeline_mode = #tpu.pipeline_mode<synchronous>, transform_indices = @transform_7, window_bounds = array<i64: 1, 32>}, {pipeline_mode = #tpu.pipeline_mode<synchronous>, transform_indices = @transform_8, window_bounds = array<i64: 32, 32>}, {pipeline_mode = #tpu.pipeline_mode<synchronous>, transform_indices = @transform_9, window_bounds = array<i64: 1, 32>}, {pipeline_mode = #tpu.pipeline_mode<synchronous>, transform_indices = @transform_10, window_bounds = array<i64: 32, 64>}, {pipeline_mode = #tpu.pipeline_mode<synchronous>, transform_indices = @transform_11, window_bounds = array<i64: 1, 64>}, {pipeline_mode = #tpu.pipeline_mode<synchronous>, transform_indices = @transform_12, window_bounds = array<i64: 32, 32>}, {pipeline_mode = #tpu.pipeline_mode<synchronous>, transform_indices = @transform_13, window_bounds = array<i64: 1, 32>}, {pipeline_mode = #tpu.pipeline_mode<synchronous>, transform_indices = @transform_14, window_bounds = array<i64: 1, 32>}, {pipeline_mode = #tpu.pipeline_mode<synchronous>, transform_indices = @transform_15, window_bounds = array<i64: 1, 32>}, {transform_indices = @transform_16, window_bounds = array<i64: 1, 8, 32>}]} {
    %c0 = arith.constant 0 : index
    %c0_0 = arith.constant 0 : index
    %c0_1 = arith.constant 0 : index
    %0 = vector.load %arg1[%c0, %c0_0, %c0_1] : memref<1x8x32xf32, #tpu.memory_space<vmem>>, vector<1x8x32xf32>
    %1 = vector.shape_cast %0 : vector<1x8x32xf32> to vector<8x32xf32>
    %2 = arith.truncf %1 : vector<8x32xf32> to vector<8x32xbf16>
    %c0_2 = arith.constant 0 : index
    %c0_3 = arith.constant 0 : index
    %3 = vector.load %arg3[%c0_2, %c0_3] : memref<32x96xbf16, #tpu.memory_space<vmem>>, vector<32x96xbf16>
    %cst = arith.constant dense<0.000000e+00> : vector<8x96xf32>
    %4 = tpu.matmul %2, %3, %cst {dimension_numbers = #tpu.dot_dimension_numbers<[1], [0], [0], [1], [0, 0, 1, 1], [], []>} : vector<8x32xbf16>, vector<32x96xbf16>, vector<8x96xf32> -> vector<8x96xf32>
    %c0_4 = arith.constant 0 : index
    %c0_5 = arith.constant 0 : index
    %5 = vector.load %arg4[%c0_4, %c0_5] : memref<1x96xf32, #tpu.memory_space<vmem>>, vector<1x96xf32>
    %6 = vector.broadcast %5 : vector<1x96xf32> to vector<8x96xf32>
    %7 = arith.addf %4, %6 : vector<8x96xf32>
    %8 = vector.extract_strided_slice %7 {offsets = [0, 0], sizes = [8, 32], strides = [1, 1]} : vector<8x96xf32> to vector<8x32xf32>
    %9 = vector.extract_strided_slice %7 {offsets = [0, 32], sizes = [8, 32], strides = [1, 1]} : vector<8x96xf32> to vector<8x32xf32>
    %10 = vector.extract_strided_slice %7 {offsets = [0, 64], sizes = [8, 32], strides = [1, 1]} : vector<8x96xf32> to vector<8x32xf32>
    %11 = arith.truncf %8 : vector<8x32xf32> to vector<8x32xbf16>
    %12 = vector.extract_strided_slice %11 {offsets = [0, 0], sizes = [8, 8], strides = [1, 1]} : vector<8x32xbf16> to vector<8x8xbf16>
    %13 = vector.shape_cast %12 : vector<8x8xbf16> to vector<1x8x8xbf16>
    %14 = vector.extract_strided_slice %11 {offsets = [0, 8], sizes = [8, 8], strides = [1, 1]} : vector<8x32xbf16> to vector<8x8xbf16>
    %15 = vector.shape_cast %14 : vector<8x8xbf16> to vector<1x8x8xbf16>
    %16 = vector.extract_strided_slice %11 {offsets = [0, 16], sizes = [8, 8], strides = [1, 1]} : vector<8x32xbf16> to vector<8x8xbf16>
    %17 = vector.shape_cast %16 : vector<8x8xbf16> to vector<1x8x8xbf16>
    %18 = vector.extract_strided_slice %11 {offsets = [0, 24], sizes = [8, 8], strides = [1, 1]} : vector<8x32xbf16> to vector<8x8xbf16>
    %19 = vector.shape_cast %18 : vector<8x8xbf16> to vector<1x8x8xbf16>
    %20 = tpu.concatenate %13, %15, %17, %19 in 0 : vector<1x8x8xbf16>, vector<1x8x8xbf16>, vector<1x8x8xbf16>, vector<1x8x8xbf16> -> vector<4x8x8xbf16>
    %21 = arith.truncf %9 : vector<8x32xf32> to vector<8x32xbf16>
    %22 = vector.extract_strided_slice %21 {offsets = [0, 0], sizes = [8, 8], strides = [1, 1]} : vector<8x32xbf16> to vector<8x8xbf16>
    %23 = vector.shape_cast %22 : vector<8x8xbf16> to vector<1x8x8xbf16>
    %24 = vector.extract_strided_slice %21 {offsets = [0, 8], sizes = [8, 8], strides = [1, 1]} : vector<8x32xbf16> to vector<8x8xbf16>
    %25 = vector.shape_cast %24 : vector<8x8xbf16> to vector<1x8x8xbf16>
    %26 = vector.extract_strided_slice %21 {offsets = [0, 16], sizes = [8, 8], strides = [1, 1]} : vector<8x32xbf16> to vector<8x8xbf16>
    %27 = vector.shape_cast %26 : vector<8x8xbf16> to vector<1x8x8xbf16>
    %28 = vector.extract_strided_slice %21 {offsets = [0, 24], sizes = [8, 8], strides = [1, 1]} : vector<8x32xbf16> to vector<8x8xbf16>
    %29 = vector.shape_cast %28 : vector<8x8xbf16> to vector<1x8x8xbf16>
    %30 = tpu.concatenate %23, %25, %27, %29 in 0 : vector<1x8x8xbf16>, vector<1x8x8xbf16>, vector<1x8x8xbf16>, vector<1x8x8xbf16> -> vector<4x8x8xbf16>
    %31 = arith.truncf %10 : vector<8x32xf32> to vector<8x32xbf16>
    %32 = vector.extract_strided_slice %31 {offsets = [0, 0], sizes = [8, 8], strides = [1, 1]} : vector<8x32xbf16> to vector<8x8xbf16>
    %33 = vector.shape_cast %32 : vector<8x8xbf16> to vector<1x8x8xbf16>
    %34 = vector.extract_strided_slice %31 {offsets = [0, 8], sizes = [8, 8], strides = [1, 1]} : vector<8x32xbf16> to vector<8x8xbf16>
    %35 = vector.shape_cast %34 : vector<8x8xbf16> to vector<1x8x8xbf16>
    %36 = vector.extract_strided_slice %31 {offsets = [0, 16], sizes = [8, 8], strides = [1, 1]} : vector<8x32xbf16> to vector<8x8xbf16>
    %37 = vector.shape_cast %36 : vector<8x8xbf16> to vector<1x8x8xbf16>
    %38 = vector.extract_strided_slice %31 {offsets = [0, 24], sizes = [8, 8], strides = [1, 1]} : vector<8x32xbf16> to vector<8x8xbf16>
    %39 = vector.shape_cast %38 : vector<8x8xbf16> to vector<1x8x8xbf16>
    %40 = tpu.concatenate %33, %35, %37, %39 in 0 : vector<1x8x8xbf16>, vector<1x8x8xbf16>, vector<1x8x8xbf16>, vector<1x8x8xbf16> -> vector<4x8x8xbf16>
    "tpu.trace_start"() <{level = 10 : i32, message = "hqd,hkd->hqk"}> : () -> ()
    %cst_6 = arith.constant dense<0.000000e+00> : vector<4x8x8xf32>
    %41 = tpu.matmul %20, %30, %cst_6 {dimension_numbers = #tpu.dot_dimension_numbers<[2], [2], [1], [1], [0, 0, 0, 1, 1, 1], [0], [0]>} : vector<4x8x8xbf16>, vector<4x8x8xbf16>, vector<4x8x8xf32> -> vector<4x8x8xf32>
    "tpu.trace_stop"() : () -> ()
    %cst_7 = arith.constant 0.353553385 : f32
    %42 = vector.broadcast %cst_7 : f32 to vector<4x8x8xf32>
    %43 = arith.mulf %41, %42 : vector<4x8x8xf32>
    %44 = tpu.iota {dimensions = array<i32: 0>} : vector<8x8xi32>
    %45 = tpu.iota {dimensions = array<i32: 1>} : vector<8x8xi32>
    %46 = arith.cmpi sge, %44, %45 : vector<8x8xi32>
    %47 = vector.shape_cast %46 : vector<8x8xi1> to vector<1x8x8xi1>
    %cst_8 = arith.constant -1.000000e+30 : f32
    %48 = vector.shape_cast %47 : vector<1x8x8xi1> to vector<1x8x8xi1>
    %49 = vector.broadcast %48 : vector<1x8x8xi1> to vector<4x8x8xi1>
    %50 = vector.broadcast %cst_8 : f32 to vector<4x8x8xf32>
    %51 = arith.select %49, %43, %50 : vector<4x8x8xi1>, vector<4x8x8xf32>
    %cst_9 = arith.constant dense<0xFF800000> : vector<4x8xf32>
    %52 = vector.multi_reduction <maximumf>, %51, %cst_9 [2] : vector<4x8x8xf32> to vector<4x8xf32>
    %53 = vector.shape_cast %52 : vector<4x8xf32> to vector<4x8x1xf32>
    %54 = vector.broadcast %53 : vector<4x8x1xf32> to vector<4x8x8xf32>
    %55 = arith.subf %51, %54 : vector<4x8x8xf32>
    %56 = math.exp %55 : vector<4x8x8xf32>
    %cst_10 = arith.constant dense<0.000000e+00> : vector<4x8xf32>
    %57 = vector.multi_reduction <add>, %56, %cst_10 [2] : vector<4x8x8xf32> to vector<4x8xf32>
    %58 = vector.shape_cast %57 : vector<4x8xf32> to vector<4x8x1xf32>
    %59 = tpu.reciprocal %58 {approx = true} : vector<4x8x1xf32> -> vector<4x8x1xf32>
    %60 = vector.broadcast %59 : vector<4x8x1xf32> to vector<4x8x8xf32>
    %61 = arith.mulf %56, %60 : vector<4x8x8xf32>
    %62 = arith.truncf %61 : vector<4x8x8xf32> to vector<4x8x8xbf16>
    "tpu.trace_start"() <{level = 10 : i32, message = "hqk,hkd->hqd"}> : () -> ()
    %cst_11 = arith.constant dense<0.000000e+00> : vector<4x8x8xf32>
    %63 = tpu.matmul %62, %40, %cst_11 {dimension_numbers = #tpu.dot_dimension_numbers<[2], [1], [1], [2], [0, 0, 0, 1, 1, 2], [0], [0]>} : vector<4x8x8xbf16>, vector<4x8x8xbf16>, vector<4x8x8xf32> -> vector<4x8x8xf32>
    "tpu.trace_stop"() : () -> ()
    %64 = vector.extract_strided_slice %63 {offsets = [0, 0, 0], sizes = [1, 8, 8], strides = [1, 1, 1]} : vector<4x8x8xf32> to vector<1x8x8xf32>
    %65 = vector.shape_cast %64 : vector<1x8x8xf32> to vector<8x8xf32>
    %66 = vector.extract_strided_slice %63 {offsets = [1, 0, 0], sizes = [1, 8, 8], strides = [1, 1, 1]} : vector<4x8x8xf32> to vector<1x8x8xf32>
    %67 = vector.shape_cast %66 : vector<1x8x8xf32> to vector<8x8xf32>
    %68 = vector.extract_strided_slice %63 {offsets = [2, 0, 0], sizes = [1, 8, 8], strides = [1, 1, 1]} : vector<4x8x8xf32> to vector<1x8x8xf32>
    %69 = vector.shape_cast %68 : vector<1x8x8xf32> to vector<8x8xf32>
    %70 = vector.extract_strided_slice %63 {offsets = [3, 0, 0], sizes = [1, 8, 8], strides = [1, 1, 1]} : vector<4x8x8xf32> to vector<1x8x8xf32>
    %71 = vector.shape_cast %70 : vector<1x8x8xf32> to vector<8x8xf32>
    %72 = tpu.concatenate %65, %67, %69, %71 in 1 : vector<8x8xf32>, vector<8x8xf32>, vector<8x8xf32>, vector<8x8xf32> -> vector<8x32xf32>
    %73 = arith.truncf %72 : vector<8x32xf32> to vector<8x32xbf16>
    %c0_12 = arith.constant 0 : index
    %c0_13 = arith.constant 0 : index
    %74 = vector.load %arg5[%c0_12, %c0_13] : memref<32x32xbf16, #tpu.memory_space<vmem>>, vector<32x32xbf16>
    %cst_14 = arith.constant dense<0.000000e+00> : vector<8x32xf32>
    %75 = tpu.matmul %73, %74, %cst_14 {dimension_numbers = #tpu.dot_dimension_numbers<[1], [0], [0], [1], [0, 0, 1, 1], [], []>} : vector<8x32xbf16>, vector<32x32xbf16>, vector<8x32xf32> -> vector<8x32xf32>
    %c0_15 = arith.constant 0 : index
    %c0_16 = arith.constant 0 : index
    %76 = vector.load %arg6[%c0_15, %c0_16] : memref<1x32xf32, #tpu.memory_space<vmem>>, vector<1x32xf32>
    %77 = vector.broadcast %76 : vector<1x32xf32> to vector<8x32xf32>
    %78 = arith.addf %75, %77 : vector<8x32xf32>
    %79 = arith.addf %1, %78 : vector<8x32xf32>
    %c0_17 = arith.constant 0 : index
    %c0_18 = arith.constant 0 : index
    %80 = vector.load %arg7[%c0_17, %c0_18] : memref<1x32xf32, #tpu.memory_space<vmem>>, vector<1x32xf32>
    %c0_19 = arith.constant 0 : index
    %c0_20 = arith.constant 0 : index
    %81 = vector.load %arg8[%c0_19, %c0_20] : memref<1x32xf32, #tpu.memory_space<vmem>>, vector<1x32xf32>
    %cst_21 = arith.constant dense<0.000000e+00> : vector<8xf32>
    %82 = vector.multi_reduction <add>, %79, %cst_21 [1] : vector<8x32xf32> to vector<8xf32>
    %83 = vector.shape_cast %82 : vector<8xf32> to vector<8x1xf32>
    %cst_22 = arith.constant 3.200000e+01 : f32
    %84 = vector.broadcast %cst_22 : f32 to vector<8x1xf32>
    %85 = arith.divf %83, %84 : vector<8x1xf32>
    %86 = vector.broadcast %85 : vector<8x1xf32> to vector<8x32xf32>
    %87 = arith.subf %79, %86 : vector<8x32xf32>
    %88 = arith.mulf %87, %87 : vector<8x32xf32>
    %cst_23 = arith.constant dense<0.000000e+00> : vector<8xf32>
    %89 = vector.multi_reduction <add>, %88, %cst_23 [1] : vector<8x32xf32> to vector<8xf32>
    %90 = vector.shape_cast %89 : vector<8xf32> to vector<8x1xf32>
    %cst_24 = arith.constant 3.200000e+01 : f32
    %91 = vector.broadcast %cst_24 : f32 to vector<8x1xf32>
    %92 = arith.divf %90, %91 : vector<8x1xf32>
    %cst_25 = arith.constant 9.99999974E-6 : f32
    %93 = vector.broadcast %cst_25 : f32 to vector<8x1xf32>
    %94 = arith.addf %92, %93 : vector<8x1xf32>
    %95 = math.rsqrt %94 : vector<8x1xf32>
    %96 = vector.broadcast %95 : vector<8x1xf32> to vector<8x32xf32>
    %97 = arith.mulf %87, %96 : vector<8x32xf32>
    %98 = vector.broadcast %80 : vector<1x32xf32> to vector<8x32xf32>
    %99 = arith.mulf %97, %98 : vector<8x32xf32>
    %100 = vector.broadcast %81 : vector<1x32xf32> to vector<8x32xf32>
    %101 = arith.addf %99, %100 : vector<8x32xf32>
    %c0_26 = arith.constant 0 : index
    %c0_27 = arith.constant 0 : index
    %c0_28 = arith.constant 0 : index
    %102 = vector.load %arg2[%c0_26, %c0_27, %c0_28] : memref<1x8x32xf32, #tpu.memory_space<vmem>>, vector<1x8x32xf32>
    %103 = vector.shape_cast %102 : vector<1x8x32xf32> to vector<8x32xf32>
    %104 = arith.truncf %103 : vector<8x32xf32> to vector<8x32xbf16>
    %105 = arith.truncf %101 : vector<8x32xf32> to vector<8x32xbf16>
    %c0_29 = arith.constant 0 : index
    %c0_30 = arith.constant 0 : index
    %106 = vector.load %arg9[%c0_29, %c0_30] : memref<32x32xbf16, #tpu.memory_space<vmem>>, vector<32x32xbf16>
    %cst_31 = arith.constant dense<0.000000e+00> : vector<8x32xf32>
    %107 = tpu.matmul %104, %106, %cst_31 {dimension_numbers = #tpu.dot_dimension_numbers<[1], [0], [0], [1], [0, 0, 1, 1], [], []>} : vector<8x32xbf16>, vector<32x32xbf16>, vector<8x32xf32> -> vector<8x32xf32>
    %c0_32 = arith.constant 0 : index
    %c0_33 = arith.constant 0 : index
    %108 = vector.load %arg10[%c0_32, %c0_33] : memref<1x32xf32, #tpu.memory_space<vmem>>, vector<1x32xf32>
    %109 = vector.broadcast %108 : vector<1x32xf32> to vector<8x32xf32>
    %110 = arith.addf %107, %109 : vector<8x32xf32>
    %c0_34 = arith.constant 0 : index
    %c0_35 = arith.constant 0 : index
    %111 = vector.load %arg11[%c0_34, %c0_35] : memref<32x64xbf16, #tpu.memory_space<vmem>>, vector<32x64xbf16>
    %cst_36 = arith.constant dense<0.000000e+00> : vector<8x64xf32>
    %112 = tpu.matmul %105, %111, %cst_36 {dimension_numbers = #tpu.dot_dimension_numbers<[1], [0], [0], [1], [0, 0, 1, 1], [], []>} : vector<8x32xbf16>, vector<32x64xbf16>, vector<8x64xf32> -> vector<8x64xf32>
    %c0_37 = arith.constant 0 : index
    %c0_38 = arith.constant 0 : index
    %113 = vector.load %arg12[%c0_37, %c0_38] : memref<1x64xf32, #tpu.memory_space<vmem>>, vector<1x64xf32>
    %114 = vector.broadcast %113 : vector<1x64xf32> to vector<8x64xf32>
    %115 = arith.addf %112, %114 : vector<8x64xf32>
    %116 = vector.extract_strided_slice %115 {offsets = [0, 0], sizes = [8, 32], strides = [1, 1]} : vector<8x64xf32> to vector<8x32xf32>
    %117 = vector.extract_strided_slice %115 {offsets = [0, 32], sizes = [8, 32], strides = [1, 1]} : vector<8x64xf32> to vector<8x32xf32>
    %118 = arith.truncf %110 : vector<8x32xf32> to vector<8x32xbf16>
    %119 = vector.extract_strided_slice %118 {offsets = [0, 0], sizes = [8, 8], strides = [1, 1]} : vector<8x32xbf16> to vector<8x8xbf16>
    %120 = vector.shape_cast %119 : vector<8x8xbf16> to vector<1x8x8xbf16>
    %121 = vector.extract_strided_slice %118 {offsets = [0, 8], sizes = [8, 8], strides = [1, 1]} : vector<8x32xbf16> to vector<8x8xbf16>
    %122 = vector.shape_cast %121 : vector<8x8xbf16> to vector<1x8x8xbf16>
    %123 = vector.extract_strided_slice %118 {offsets = [0, 16], sizes = [8, 8], strides = [1, 1]} : vector<8x32xbf16> to vector<8x8xbf16>
    %124 = vector.shape_cast %123 : vector<8x8xbf16> to vector<1x8x8xbf16>
    %125 = vector.extract_strided_slice %118 {offsets = [0, 24], sizes = [8, 8], strides = [1, 1]} : vector<8x32xbf16> to vector<8x8xbf16>
    %126 = vector.shape_cast %125 : vector<8x8xbf16> to vector<1x8x8xbf16>
    %127 = tpu.concatenate %120, %122, %124, %126 in 0 : vector<1x8x8xbf16>, vector<1x8x8xbf16>, vector<1x8x8xbf16>, vector<1x8x8xbf16> -> vector<4x8x8xbf16>
    %128 = arith.truncf %116 : vector<8x32xf32> to vector<8x32xbf16>
    %129 = vector.extract_strided_slice %128 {offsets = [0, 0], sizes = [8, 8], strides = [1, 1]} : vector<8x32xbf16> to vector<8x8xbf16>
    %130 = vector.shape_cast %129 : vector<8x8xbf16> to vector<1x8x8xbf16>
    %131 = vector.extract_strided_slice %128 {offsets = [0, 8], sizes = [8, 8], strides = [1, 1]} : vector<8x32xbf16> to vector<8x8xbf16>
    %132 = vector.shape_cast %131 : vector<8x8xbf16> to vector<1x8x8xbf16>
    %133 = vector.extract_strided_slice %128 {offsets = [0, 16], sizes = [8, 8], strides = [1, 1]} : vector<8x32xbf16> to vector<8x8xbf16>
    %134 = vector.shape_cast %133 : vector<8x8xbf16> to vector<1x8x8xbf16>
    %135 = vector.extract_strided_slice %128 {offsets = [0, 24], sizes = [8, 8], strides = [1, 1]} : vector<8x32xbf16> to vector<8x8xbf16>
    %136 = vector.shape_cast %135 : vector<8x8xbf16> to vector<1x8x8xbf16>
    %137 = tpu.concatenate %130, %132, %134, %136 in 0 : vector<1x8x8xbf16>, vector<1x8x8xbf16>, vector<1x8x8xbf16>, vector<1x8x8xbf16> -> vector<4x8x8xbf16>
    %138 = arith.truncf %117 : vector<8x32xf32> to vector<8x32xbf16>
    %139 = vector.extract_strided_slice %138 {offsets = [0, 0], sizes = [8, 8], strides = [1, 1]} : vector<8x32xbf16> to vector<8x8xbf16>
    %140 = vector.shape_cast %139 : vector<8x8xbf16> to vector<1x8x8xbf16>
    %141 = vector.extract_strided_slice %138 {offsets = [0, 8], sizes = [8, 8], strides = [1, 1]} : vector<8x32xbf16> to vector<8x8xbf16>
    %142 = vector.shape_cast %141 : vector<8x8xbf16> to vector<1x8x8xbf16>
    %143 = vector.extract_strided_slice %138 {offsets = [0, 16], sizes = [8, 8], strides = [1, 1]} : vector<8x32xbf16> to vector<8x8xbf16>
    %144 = vector.shape_cast %143 : vector<8x8xbf16> to vector<1x8x8xbf16>
    %145 = vector.extract_strided_slice %138 {offsets = [0, 24], sizes = [8, 8], strides = [1, 1]} : vector<8x32xbf16> to vector<8x8xbf16>
    %146 = vector.shape_cast %145 : vector<8x8xbf16> to vector<1x8x8xbf16>
    %147 = tpu.concatenate %140, %142, %144, %146 in 0 : vector<1x8x8xbf16>, vector<1x8x8xbf16>, vector<1x8x8xbf16>, vector<1x8x8xbf16> -> vector<4x8x8xbf16>
    "tpu.trace_start"() <{level = 10 : i32, message = "hqd,hkd->hqk"}> : () -> ()
    %cst_39 = arith.constant dense<0.000000e+00> : vector<4x8x8xf32>
    %148 = tpu.matmul %127, %137, %cst_39 {dimension_numbers = #tpu.dot_dimension_numbers<[2], [2], [1], [1], [0, 0, 0, 1, 1, 1], [0], [0]>} : vector<4x8x8xbf16>, vector<4x8x8xbf16>, vector<4x8x8xf32> -> vector<4x8x8xf32>
    "tpu.trace_stop"() : () -> ()
    %cst_40 = arith.constant 0.353553385 : f32
    %149 = vector.broadcast %cst_40 : f32 to vector<4x8x8xf32>
    %150 = arith.mulf %148, %149 : vector<4x8x8xf32>
    %cst_41 = arith.constant dense<0xFF800000> : vector<4x8xf32>
    %151 = vector.multi_reduction <maximumf>, %150, %cst_41 [2] : vector<4x8x8xf32> to vector<4x8xf32>
    %152 = vector.shape_cast %151 : vector<4x8xf32> to vector<4x8x1xf32>
    %153 = vector.broadcast %152 : vector<4x8x1xf32> to vector<4x8x8xf32>
    %154 = arith.subf %150, %153 : vector<4x8x8xf32>
    %155 = math.exp %154 : vector<4x8x8xf32>
    %cst_42 = arith.constant dense<0.000000e+00> : vector<4x8xf32>
    %156 = vector.multi_reduction <add>, %155, %cst_42 [2] : vector<4x8x8xf32> to vector<4x8xf32>
    %157 = vector.shape_cast %156 : vector<4x8xf32> to vector<4x8x1xf32>
    %158 = tpu.reciprocal %157 {approx = true} : vector<4x8x1xf32> -> vector<4x8x1xf32>
    %159 = vector.broadcast %158 : vector<4x8x1xf32> to vector<4x8x8xf32>
    %160 = arith.mulf %155, %159 : vector<4x8x8xf32>
    %161 = arith.truncf %160 : vector<4x8x8xf32> to vector<4x8x8xbf16>
    "tpu.trace_start"() <{level = 10 : i32, message = "hqk,hkd->hqd"}> : () -> ()
    %cst_43 = arith.constant dense<0.000000e+00> : vector<4x8x8xf32>
    %162 = tpu.matmul %161, %147, %cst_43 {dimension_numbers = #tpu.dot_dimension_numbers<[2], [1], [1], [2], [0, 0, 0, 1, 1, 2], [0], [0]>} : vector<4x8x8xbf16>, vector<4x8x8xbf16>, vector<4x8x8xf32> -> vector<4x8x8xf32>
    "tpu.trace_stop"() : () -> ()
    %163 = vector.extract_strided_slice %162 {offsets = [0, 0, 0], sizes = [1, 8, 8], strides = [1, 1, 1]} : vector<4x8x8xf32> to vector<1x8x8xf32>
    %164 = vector.shape_cast %163 : vector<1x8x8xf32> to vector<8x8xf32>
    %165 = vector.extract_strided_slice %162 {offsets = [1, 0, 0], sizes = [1, 8, 8], strides = [1, 1, 1]} : vector<4x8x8xf32> to vector<1x8x8xf32>
    %166 = vector.shape_cast %165 : vector<1x8x8xf32> to vector<8x8xf32>
    %167 = vector.extract_strided_slice %162 {offsets = [2, 0, 0], sizes = [1, 8, 8], strides = [1, 1, 1]} : vector<4x8x8xf32> to vector<1x8x8xf32>
    %168 = vector.shape_cast %167 : vector<1x8x8xf32> to vector<8x8xf32>
    %169 = vector.extract_strided_slice %162 {offsets = [3, 0, 0], sizes = [1, 8, 8], strides = [1, 1, 1]} : vector<4x8x8xf32> to vector<1x8x8xf32>
    %170 = vector.shape_cast %169 : vector<1x8x8xf32> to vector<8x8xf32>
    %171 = tpu.concatenate %164, %166, %168, %170 in 1 : vector<8x8xf32>, vector<8x8xf32>, vector<8x8xf32>, vector<8x8xf32> -> vector<8x32xf32>
    %172 = arith.truncf %171 : vector<8x32xf32> to vector<8x32xbf16>
    %c0_44 = arith.constant 0 : index
    %c0_45 = arith.constant 0 : index
    %173 = vector.load %arg13[%c0_44, %c0_45] : memref<32x32xbf16, #tpu.memory_space<vmem>>, vector<32x32xbf16>
    %cst_46 = arith.constant dense<0.000000e+00> : vector<8x32xf32>
    %174 = tpu.matmul %172, %173, %cst_46 {dimension_numbers = #tpu.dot_dimension_numbers<[1], [0], [0], [1], [0, 0, 1, 1], [], []>} : vector<8x32xbf16>, vector<32x32xbf16>, vector<8x32xf32> -> vector<8x32xf32>
    %c0_47 = arith.constant 0 : index
    %c0_48 = arith.constant 0 : index
    %175 = vector.load %arg14[%c0_47, %c0_48] : memref<1x32xf32, #tpu.memory_space<vmem>>, vector<1x32xf32>
    %176 = vector.broadcast %175 : vector<1x32xf32> to vector<8x32xf32>
    %177 = arith.addf %174, %176 : vector<8x32xf32>
    %178 = arith.addf %78, %177 : vector<8x32xf32>
    %c0_49 = arith.constant 0 : index
    %c0_50 = arith.constant 0 : index
    %179 = vector.load %arg15[%c0_49, %c0_50] : memref<1x32xf32, #tpu.memory_space<vmem>>, vector<1x32xf32>
    %c0_51 = arith.constant 0 : index
    %c0_52 = arith.constant 0 : index
    %180 = vector.load %arg16[%c0_51, %c0_52] : memref<1x32xf32, #tpu.memory_space<vmem>>, vector<1x32xf32>
    %cst_53 = arith.constant dense<0.000000e+00> : vector<8xf32>
    %181 = vector.multi_reduction <add>, %178, %cst_53 [1] : vector<8x32xf32> to vector<8xf32>
    %182 = vector.shape_cast %181 : vector<8xf32> to vector<8x1xf32>
    %cst_54 = arith.constant 3.200000e+01 : f32
    %183 = vector.broadcast %cst_54 : f32 to vector<8x1xf32>
    %184 = arith.divf %182, %183 : vector<8x1xf32>
    %185 = vector.broadcast %184 : vector<8x1xf32> to vector<8x32xf32>
    %186 = arith.subf %178, %185 : vector<8x32xf32>
    %187 = arith.mulf %186, %186 : vector<8x32xf32>
    %cst_55 = arith.constant dense<0.000000e+00> : vector<8xf32>
    %188 = vector.multi_reduction <add>, %187, %cst_55 [1] : vector<8x32xf32> to vector<8xf32>
    %189 = vector.shape_cast %188 : vector<8xf32> to vector<8x1xf32>
    %cst_56 = arith.constant 3.200000e+01 : f32
    %190 = vector.broadcast %cst_56 : f32 to vector<8x1xf32>
    %191 = arith.divf %189, %190 : vector<8x1xf32>
    %cst_57 = arith.constant 9.99999974E-6 : f32
    %192 = vector.broadcast %cst_57 : f32 to vector<8x1xf32>
    %193 = arith.addf %191, %192 : vector<8x1xf32>
    %194 = math.rsqrt %193 : vector<8x1xf32>
    %195 = vector.broadcast %194 : vector<8x1xf32> to vector<8x32xf32>
    %196 = arith.mulf %186, %195 : vector<8x32xf32>
    %197 = vector.broadcast %179 : vector<1x32xf32> to vector<8x32xf32>
    %198 = arith.mulf %196, %197 : vector<8x32xf32>
    %199 = vector.broadcast %180 : vector<1x32xf32> to vector<8x32xf32>
    %200 = arith.addf %198, %199 : vector<8x32xf32>
    %c0_58 = arith.constant 0 : index
    %c0_59 = arith.constant 0 : index
    %c0_60 = arith.constant 0 : index
    %201 = vector.load %arg17[%c0_58, %c0_59, %c0_60] : memref<1x8x32xf32, #tpu.memory_space<vmem>>, vector<1x8x32xf32>
    %202 = vector.shape_cast %201 : vector<1x8x32xf32> to vector<8x32xf32>
    %203 = vector.shape_cast %200 : vector<8x32xf32> to vector<1x8x32xf32>
    tpu.vector_store %arg17[%c0_58, %c0_59, %c0_60], %203 {strides = array<i32>} : memref<1x8x32xf32, #tpu.memory_space<vmem>>, vector<1x8x32xf32>,
    return
  }
  func.func @transform_0(%arg0: i32) -> (i32, i32, i32) {
    %c0_i32 = arith.constant 0 : i32
    %c0_i32_0 = arith.constant 0 : i32
    %c0_i32_1 = arith.constant 0 : i32
    return %arg0, %c0_i32, %c0_i32_0 : i32, i32, i32
  }
  func.func @transform_1(%arg0: i32) -> (i32, i32, i32) {
    %c0_i32 = arith.constant 0 : i32
    %c0_i32_0 = arith.constant 0 : i32
    %c0_i32_1 = arith.constant 0 : i32
    return %arg0, %c0_i32, %c0_i32_0 : i32, i32, i32
  }
  func.func @transform_2(%arg0: i32) -> (i32, i32) {
    %c0_i32 = arith.constant 0 : i32
    %c0_i32_0 = arith.constant 0 : i32
    %c0_i32_1 = arith.constant 0 : i32
    return %c0_i32, %c0_i32_0 : i32, i32
  }
  func.func @transform_3(%arg0: i32) -> (i32, i32) {
    %c0_i32 = arith.constant 0 : i32
    %c0_i32_0 = arith.constant 0 : i32
    %c0_i32_1 = arith.constant 0 : i32
    return %c0_i32, %c0_i32_0 : i32, i32
  }
  func.func @transform_4(%arg0: i32) -> (i32, i32) {
    %c0_i32 = arith.constant 0 : i32
    %c0_i32_0 = arith.constant 0 : i32
    %c0_i32_1 = arith.constant 0 : i32
    return %c0_i32, %c0_i32_0 : i32, i32
  }
  func.func @transform_5(%arg0: i32) -> (i32, i32) {
    %c0_i32 = arith.constant 0 : i32
    %c0_i32_0 = arith.constant 0 : i32
    %c0_i32_1 = arith.constant 0 : i32
    return %c0_i32, %c0_i32_0 : i32, i32
  }
  func.func @transform_6(%arg0: i32) -> (i32, i32) {
    %c0_i32 = arith.constant 0 : i32
    %c0_i32_0 = arith.constant 0 : i32
    %c0_i32_1 = arith.constant 0 : i32
    return %c0_i32, %c0_i32_0 : i32, i32
  }
  func.func @transform_7(%arg0: i32) -> (i32, i32) {
    %c0_i32 = arith.constant 0 : i32
    %c0_i32_0 = arith.constant 0 : i32
    %c0_i32_1 = arith.constant 0 : i32
    return %c0_i32, %c0_i32_0 : i32, i32
  }
  func.func @transform_8(%arg0: i32) -> (i32, i32) {
    %c0_i32 = arith.constant 0 : i32
    %c0_i32_0 = arith.constant 0 : i32
    %c0_i32_1 = arith.constant 0 : i32
    return %c0_i32, %c0_i32_0 : i32, i32
  }
  func.func @transform_9(%arg0: i32) -> (i32, i32) {
    %c0_i32 = arith.constant 0 : i32
    %c0_i32_0 = arith.constant 0 : i32
    %c0_i32_1 = arith.constant 0 : i32
    return %c0_i32, %c0_i32_0 : i32, i32
  }
  func.func @transform_10(%arg0: i32) -> (i32, i32) {
    %c0_i32 = arith.constant 0 : i32
    %c0_i32_0 = arith.constant 0 : i32
    %c0_i32_1 = arith.constant 0 : i32
    return %c0_i32, %c0_i32_0 : i32, i32
  }
  func.func @transform_11(%arg0: i32) -> (i32, i32) {
    %c0_i32 = arith.constant 0 : i32
    %c0_i32_0 = arith.constant 0 : i32
    %c0_i32_1 = arith.constant 0 : i32
    return %c0_i32, %c0_i32_0 : i32, i32
  }
  func.func @transform_12(%arg0: i32) -> (i32, i32) {
    %c0_i32 = arith.constant 0 : i32
    %c0_i32_0 = arith.constant 0 : i32
    %c0_i32_1 = arith.constant 0 : i32
    return %c0_i32, %c0_i32_0 : i32, i32
  }
  func.func @transform_13(%arg0: i32) -> (i32, i32) {
    %c0_i32 = arith.constant 0 : i32
    %c0_i32_0 = arith.constant 0 : i32
    %c0_i32_1 = arith.constant 0 : i32
    return %c0_i32, %c0_i32_0 : i32, i32
  }
  func.func @transform_14(%arg0: i32) -> (i32, i32) {
    %c0_i32 = arith.constant 0 : i32
    %c0_i32_0 = arith.constant 0 : i32
    %c0_i32_1 = arith.constant 0 : i32
    return %c0_i32, %c0_i32_0 : i32, i32
  }
  func.func @transform_15(%arg0: i32) -> (i32, i32) {
    %c0_i32 = arith.constant 0 : i32
    %c0_i32_0 = arith.constant 0 : i32
    %c0_i32_1 = arith.constant 0 : i32
    return %c0_i32, %c0_i32_0 : i32, i32
  }
  func.func @transform_16(%arg0: i32) -> (i32, i32, i32) {
    %c0_i32 = arith.constant 0 : i32
    %c0_i32_0 = arith.constant 0 : i32
    %c0_i32_1 = arith.constant 0 : i32
    return %arg0, %c0_i32, %c0_i32_0 : i32, i32, i32
  }
}

</mosaic_0001>

<bundles_post_ra>
// kernel: tpu_custom_call.1
= control target key start
LH: loop header
LB: loop body
LE: loop exit
PB: predicated region body
PF: predicated region fallthrough
CT: control target
= control target key end

     0   :  { %s3562_s0 = inlined_call_operand.hbm [shape: f32[2,8,32], index: 0, kind: input, shape index: {}]   ;;  %s3563_s1 = inlined_call_operand.hbm [shape: f32[2,8,32], index: 1, kind: input, shape index: {}]   ;;  %s3564_s2 = inlined_call_operand.hbm [shape: bf16[32,96], index: 2, kind: input, shape index: {}]   ;;  %s3565_s3 = inlined_call_operand.vmem [shape: f32[1,96], index: 3, kind: input, shape index: {}]   ;;  %s3566_s4 = inlined_call_operand.hbm [shape: bf16[32,32], index: 4, kind: input, shape index: {}]   ;;  %s3567_s5 = inlined_call_operand.vmem [shape: f32[1,32], index: 5, kind: input, shape index: {}]   ;;  %s3568_s6 = inlined_call_operand.hbm [shape: f32[1,32], index: 6, kind: input, shape index: {}]   ;;  %s3569_s7 = inlined_call_operand.hbm [shape: f32[1,32], index: 7, kind: input, shape index: {}]   ;;  %s3570_s8 = inlined_call_operand.hbm [shape: bf16[32,32], index: 8, kind: input, shape index: {}]   ;;  %s3571_s9 = inlined_call_operand.hbm [shape: f32[1,32], index: 9, kind: input, shape index: {}]   ;;  %s3572_s10 = inlined_call_operand.vmem [shape: bf16[32,64], index: 10, kind: input, shape index: {}]   ;;  %s3573_s11 = inlined_call_operand.vmem [shape: f32[1,64], index: 11, kind: input, shape index: {}]   ;;  %s3574_s12 = inlined_call_operand.hbm [shape: bf16[32,32], index: 12, kind: input, shape index: {}]   ;;  %s3575_s13 = inlined_call_operand.vmem [shape: f32[1,32], index: 13, kind: input, shape index: {}]   ;;  %s3576_s14 = inlined_call_operand.vmem [shape: f32[1,32], index: 14, kind: input, shape index: {}]   ;;  %s3577_s15 = inlined_call_operand.vmem [shape: f32[1,32], index: 15, kind: input, shape index: {}]   ;;  %s3578_s16 = inlined_call_operand.hbm [shape: f32[2,8,32], index: 16, kind: output, shape index: {}]  }
   0x1   :  { %3593 = sst [smem:[#allocation29_spill]] %s3562_s0 }
   0x2   :  { %3594 = sst [smem:[#allocation30_spill]] %s3564_s2 }
   0x3   :  { %3595 = sst [smem:[#allocation31_spill]] %s3566_s4 }
   0x4   :  { %3596 = sst [smem:[#allocation32_spill]] %s3568_s6 }
   0x5   :  { %3597 = sst [smem:[#allocation33_spill]] %s3569_s7 }
   0x6   :  { %3598 = sst [smem:[#allocation34_spill]] %s3570_s8 }
   0x7   :  { %3599 = sst [smem:[#allocation35_spill]] %s3571_s9 }
   0x8   :  { %3600 = sst [smem:[#allocation36_spill]] %s3574_s12 }
   0x9   :  { %3601 = sst [smem:[#allocation37_spill]] %s3577_s15 }
   0xa   :  { %3602 = sst [smem:[#allocation38_spill]] %s3578_s16 }
   0xb   :  { %21 = vsyncpa [#allocation3], 0 }
   0xc   :  { %23 = vsyncpa [#allocation3 + $0x1], 0 }
   0xd   :  { %24 = vsyncpa [#allocation6], 0 }
   0xe   :  { %26 = vsyncpa [#allocation6 + $0x1], 0 }
   0xf   :  { %27 = vsyncpa [#allocation9], 0 }
  0x10   :  { %28 = vsyncpa [#allocation12], 0 }
  0x11   :  { %29 = vsyncpa [#allocation15], 0 }
  0x12   :  { %30 = vsyncpa [#allocation4], 0 }
  0x13   :  { %32 = vsyncpa [#allocation4 + $0x1], 0  ;;  %s3039_s21 = smov 0   ;;  %s3041_s22 = smov 0  }
  0x14   :  { %s3043_s23 = smov 0   ;;  %s3045_s24 = smov 0  }
  0x15 LB: > { %3603 = sst [smem:[#allocation25_spill]] %s2926_s23  ;;  %s2932_s25 = smov [#allocation7]   ;;  %s2930_s24 = sphi %s3045_s24, %s3641_s24   ;;  %s2926_s23 = sphi %s3043_s23, %s3643_s23   ;;  %s2922_s22 = sphi %s3041_s22, %s3645_s22   ;;  %s2918_s21 = sphi %s3039_s21, %s3644_s21  }
  0x16   : > { %s427_s26 = sshll.u32 %s2932_s25, 4  ;;  %s3060_s27 = sadd.s32 4294967295, %s2930_s24   ;;  %s428_s26 = int_to_ptr.vmem [resolvable:$true] %s427_s26 }
  0x17   : > { %p2177_p0 = scmp.ge.s32.totalorder %s2930_s24, 1  ;;  %p3585_p1 = scmp.eq.s32.totalorder %s3060_s27, 0 }
  0x18   : > { %p415_p2 = scmp.lt.s32.totalorder %s2930_s24, 3  ;;  %s2933_s29 = smov [#allocation8]  }
  0x19   : > { %s443_s30 = sshll.u32 %s2933_s29, 4  ;;  %s2934_s17 = smov [#allocation11]   ;;  %s3078_s30 = int_to_ptr.vmem [resolvable:$true] %s443_s30 }
  0x1a   : > { %p3065_p3 = pnand %p2177_p0, %p415_p2  ;;  %s471_s18 = sshll.u32 %s2934_s17, 4  ;;  %s3080_s18 = int_to_ptr.vmem [resolvable:$true] %s471_s18 }
  0x1b   : > { %s2619_s20 = scalar_lea.vmem %s428_s26, 256  ;;  %p2627_p11 = scmp.lt.s32.totalorder %s428_s26, %s428_s26 }
  0x1c   : > { %s3604_s28 = scalar_select %p3065_p3, 1, 0 }
  0x1d   : > { %p2462_p5 = pneg %p3065_p3  ;;  %p2620_p8 = scmp.ne.s32.totalorder %s428_s26, %s2619_s20 }
  0x1e   : > { %p2628_p12 = scmp.lt.s32.totalorder %s2619_s20, %s2619_s20 }
  0x1f   : > { %p3074_p6 = pnand %p2462_p5, %p3585_p1 }
  0x20   : > { %p2629_p13 = por %p2628_p12, %p2627_p11 }
  0x21   : > { %p3084_p7 = pneg %p3074_p6 }
  0x23   : > { %p2622_p9 = pnand %p2620_p8, %p3084_p7 }
  0x25   : > { %p2623_p10 = pneg %p2622_p9 }
  0x27   : > { %p2630_p0 = pnand %p2629_p13, %p2623_p10 }
  0x29   : > { %2633 = shalt.err (!%p2630_p0)
}
  0x2a   : > { %s3581_s25 = smov 64   ;;  %s3583_s29 = smov 4  }
  0x2b   : > { %s3607_s2 = sld [smem:[#allocation30_spill]]  ;;  %s2645_s15 = scalar_lea.vmem %s3078_s30, 256 }
  0x2c   : > { %p2646_p2 = scmp.ne.s32.totalorder %s3078_s30, %s2645_s15  ;;  %p2653_p9 = scmp.lt.s32.totalorder %s3078_s30, %s3078_s30 }
  0x2d   : > { %p2654_p10 = scmp.lt.s32.totalorder %s2645_s15, %s2645_s15 }
  0x2e   : > { %p2648_p5 = pnand %p2646_p2, %p3084_p7 }
  0x2f   : > { %p2655_p11 = por %p2654_p10, %p2653_p9 }
  0x30   : > { %p2649_p8 = pneg %p2648_p5 }
  0x31   : > { %2465 = dma.hbm_to_vmem [thread:$0]  (!%p3074_p6), %s3607_s2, 256, %s428_s26, [#allocation6], %s3581_s25, %s3581_s25, %s3583_s29  }
  0x32   : > { %p2656_p12 = pnand %p2655_p11, %p2649_p8 }
  0x34   : > { %2659 = shalt.err (!%p2656_p12)
}
  0x35   : > { %s3608_s4 = sld [smem:[#allocation31_spill]]  ;;  %s2671_s26 = scalar_lea.vmem %s3080_s18, 16 }
  0x36   : > { %p2672_p13 = scmp.ne.s32.totalorder %s3080_s18, %s2671_s26  ;;  %s2678_s15 = scalar_lea.vmem %s3080_s18, 32 }
  0x37   : > { %p2679_p5 = scmp.lt.s32.totalorder %s3080_s18, %s3080_s18  ;;  %p2680_p8 = scmp.lt.s32.totalorder %s2678_s15, %s2671_s26 }
  0x38   : > { %p2674_p0 = pnand %p2672_p13, %p3084_p7 }
  0x39   : > { %p2681_p9 = por %p2680_p8, %p2679_p5 }
  0x3a   : > { %p2675_p2 = pneg %p2674_p0 }
  0x3b   : > { %2468 = dma.hbm_to_vmem [thread:$0]  (!%p3074_p6), %s3608_s4, 256, %s3078_s30, [#allocation9], %s3581_s25, %s3581_s25, %s3583_s29  }
  0x3c   : > { %p2682_p10 = pnand %p2681_p9, %p2675_p2 }
  0x3e   : > { %2685 = shalt.err (!%p2682_p10)
}
  0x3f   : > { %s3609_s7 = sld [smem:[#allocation33_spill]]  ;;  %s2937_s30 = smov [#allocation14]  }
  0x40   : > { %s495_s16 = sshll.u32 %s2937_s30, 4  ;;  %s2938_s25 = smov [#allocation10]   ;;  %s496_s16 = int_to_ptr.vmem [resolvable:$true] %s495_s16 }
  0x41   : > { %s460_s29 = sshll.u32 %s2938_s25, 4  ;;  %s2697_s2 = scalar_lea.vmem %s496_s16, 16  ;;  %s461_s29 = int_to_ptr.vmem [resolvable:$true] %s460_s29 }
  0x42   : > { %p2698_p11 = scmp.ne.s32.totalorder %s496_s16, %s2697_s2  ;;  %s2704_s26 = scalar_lea.vmem %s496_s16, 32 }
  0x43   : > { %p2705_p0 = scmp.lt.s32.totalorder %s496_s16, %s496_s16  ;;  %p2706_p2 = scmp.lt.s32.totalorder %s2704_s26, %s2697_s2 }
  0x44   : > { %p2700_p12 = pnand %p2698_p11, %p3084_p7 }
  0x45   : > { %2474 = dma.hbm_to_vmem [thread:$0]  (!%p3074_p6), %s3609_s7, 16, %s3080_s18, [#allocation12]  }
  0x46   : > { %p2701_p13 = pneg %p2700_p12  ;;  %p2707_p5 = por %p2706_p2, %p2705_p0 }
  0x48   : > { %p2708_p8 = pnand %p2707_p5, %p2701_p13 }
  0x4a   : > { %2711 = shalt.err (!%p2708_p8)
}
  0x4b   : > { %s3610_s9 = sld [smem:[#allocation35_spill]]  ;;  %s2723_s25 = scalar_lea.vmem %s461_s29, 16 }
  0x4c   : > { %p2724_p9 = scmp.ne.s32.totalorder %s461_s29, %s2723_s25  ;;  %s2730_s17 = scalar_lea.vmem %s461_s29, 32 }
  0x4d   : > { %p2731_p12 = scmp.lt.s32.totalorder %s461_s29, %s461_s29  ;;  %p2732_p4 = scmp.lt.s32.totalorder %s2730_s17, %s2723_s25 }
  0x4e   : > { %p2726_p10 = pnand %p2724_p9, %p3084_p7 }
  0x4f   : > { %p2733_p1 = por %p2732_p4, %p2731_p12 }
  0x50   : > { %p2727_p11 = pneg %p2726_p10 }
  0x51   : > { %2480 = dma.hbm_to_vmem [thread:$0]  (!%p3074_p6), %s3610_s9, 16, %s496_s16, [#allocation15]  }
  0x52   : > { %p2734_p0 = pnand %p2733_p1, %p2727_p11 }
  0x54   : > { %2737 = shalt.err (!%p2734_p0)
}
  0x55   : > { %s3611_s6 = sld [smem:[#allocation32_spill]]  ;;  %s2939_s30 = smov [#allocation13]  }
  0x56   : > { %s481_s16 = sshll.u32 %s2939_s30, 4  ;;  %s2940_s26 = smov [#allocation16]   ;;  %s482_s16 = int_to_ptr.vmem [resolvable:$true] %s481_s16 }
  0x57   : > { %s511_s15 = sshll.u32 %s2940_s26, 4  ;;  %s2749_s18 = scalar_lea.vmem %s482_s16, 256  ;;  %s512_s15 = int_to_ptr.vmem [resolvable:$true] %s511_s15 }
  0x58   : > { %p2750_p13 = scmp.ne.s32.totalorder %s482_s16, %s2749_s18  ;;  %p2757_p4 = scmp.lt.s32.totalorder %s482_s16, %s482_s16 }
  0x59   : > { %p2758_p1 = scmp.lt.s32.totalorder %s2749_s18, %s2749_s18 }
  0x5a   : > { %p2752_p2 = pnand %p2750_p13, %p3084_p7 }
  0x5b   : > { %2471 = dma.hbm_to_vmem [thread:$0]  (!%p3074_p6), %s3611_s6, 16, %s461_s29, [#allocation9]  }
  0x5c   : > { %p2753_p5 = pneg %p2752_p2  ;;  %p2759_p8 = por %p2758_p1, %p2757_p4 }
  0x5e   : > { %p2760_p9 = pnand %p2759_p8, %p2753_p5 }
  0x60   : > { %2763 = shalt.err (!%p2760_p9)
}
  0x61   : > { %s3612_s25 = smov 4   ;;  %s3613_s17 = smov 64  }
  0x62   : > { %s3614_s8 = sld [smem:[#allocation34_spill]]  ;;  %s2775_s20 = scalar_lea.vmem %s512_s15, 256 }
  0x63   : > { %p2776_p10 = scmp.ne.s32.totalorder %s512_s15, %s2775_s20  ;;  %p2783_p0 = scmp.lt.s32.totalorder %s512_s15, %s512_s15 }
  0x64   : > { %p2784_p13 = scmp.lt.s32.totalorder %s2775_s20, %s2775_s20 }
  0x65   : > { %p2778_p11 = pnand %p2776_p10, %p3084_p7 }
  0x66   : > { %p2785_p2 = por %p2784_p13, %p2783_p0 }
  0x67   : > { %p2779_p12 = pneg %p2778_p11 }
  0x68   : > { %2477 = dma.hbm_to_vmem [thread:$0]  (!%p3074_p6), %s3614_s8, 256, %s482_s16, [#allocation12], %s3613_s17, %s3613_s17, %s3612_s25  }
  0x69   : > { %p2786_p5 = pnand %p2785_p2, %p2779_p12 }
  0x6b   : > { %2789 = shalt.err (!%p2786_p5)
}
  0x6c   : > { %s3615_s12 = sld [smem:[#allocation36_spill]]  ;;  %s2176_s0 = sadd.s32 4294967294, %s2930_s24  }
  0x6d   : > { %s3162_s19 = sadd.s32 1, %s2930_s24   ;;  %s45_s16 = sadd.s32 1, %s2926_s23 }
  0x6e   : > { %3616 = sst [smem:[#allocation26_spill]] %s3162_s19  ;;  %s42_s18 = ssub.s32 %s2930_s24, %s3162_s19 }
  0x6f   : > { %p52_p7 = scmp.ne.s32.totalorder %s2926_s23, %s2922_s22  ;;  %p43_p4 = scmp.eq.s32.totalorder %s42_s18, 0 }
  0x70   : > { %p53_p1 = scmp.eq.s32.totalorder %s2930_s24, 0  ;;  %p58_p8 = scmp.ne.s32.totalorder %s2922_s22, %s2918_s21 }
  0x71   : > { %p402_p9 = scmp.eq.s32.totalorder %s3060_s27, 1  ;;  %p3618_p11 = scmp.eq.s32.totalorder %s3060_s27, 0 }
  0x72   : > { %2483 = dma.hbm_to_vmem [thread:$0]  (!%p3074_p6), %s3615_s12, 256, %s512_s15, [#allocation15], %s3613_s17, %s3613_s17, %s3612_s25  }
  0x73   : > { %s3174_s29 = scalar_select %p43_p4, %s2926_s23, %s45_s16  }
  0x74   : > { %p54_p10 = por %p53_p1, %p52_p7  ;;  %p3178_p12 = por %p3618_p11, %p58_p8 }
  0x75   : > { %3617 = sst [smem:[#allocation27_spill]] %s3174_s29  ;;  %p3182_p6 = por %p402_p9, %p52_p7 }
  0x76   : > { %s3619_s2 = scalar_select %p3178_p12, 1, 0 }
  0x77   : > { %s3620_s15 = scalar_select %p3182_p6, 1, 0 }
  0x78   : > { %p408_p0 = scmp.eq.s32.totalorder %s2176_s0, 1  ;;  %p2502_p13 = scmp.lt.s32.totalorder %s2930_s24, 2 }
  0x79   : > { %s534_s25 = sand.u32 1, %s2926_s23   ;;  %s2187_s30 = sshll.u32 %s2930_s24, 7 }
  0x7a   : > { %p3188_p2 = por %p408_p0, %p58_p8  ;;  %s3192_s20 = sshll.u32 %s534_s25, 3 }
  0x7b   : > { %s3623_s18 = sld [smem:[#allocation29_spill]]  ;;  %s538_s6 = scalar_lea.vmem [#allocation2], %s3192_s20 }
  0x7c   : > { %s3621_s17 = scalar_select %p3188_p2, 1, 0 }
  0x7d   : > { %s545_s0 = sshll.u32 %s538_s6, 4  ;;  %p3201_p5 = pnand %p2502_p13, %p54_p10  ;;  %s546_s0 = int_to_ptr.vmem [resolvable:$true] %s545_s0 }
  0x7e   : > { %3622 = sst [smem:[#allocation28_spill]] %s3621_s17  ;;  %s3208_s12 = scalar_lea.hbm %s3563_s1, %s2187_s30 }
  0x7f   : > { %s535_s26 = scalar_lea.sflag [#allocation3], %s534_s25  ;;  %p2792_p4 = pneg %p3201_p5 }
  0x81   : > { %s3198_s4 = scalar_lea.hbm %s3623_s18, %s2187_s30  ;;  %s2795_s23 = scalar_lea.hbm %s3623_s18, 256 }
  0x82   : > { %s2790_s16 = scalar_lea.hbm %s3198_s4, 128  ;;  %p2796_p9 = scmp.lt.s32.totalorder %s3198_s4, %s3623_s18 }
  0x83   : > { %p2791_p7 = scmp.ne.s32.totalorder %s3198_s4, %s2790_s16  ;;  %p2797_p10 = scmp.lt.s32.totalorder %s2795_s23, %s2790_s16 }
  0x85   : > { %p2793_p1 = pnand %p2792_p4, %p2791_p7  ;;  %p2798_p11 = por %p2797_p10, %p2796_p9 }
  0x87   : > { %p2794_p8 = pneg %p2793_p1 }
  0x89   : > { %p2799_p0 = pnand %p2798_p11, %p2794_p8 }
  0x8b   : > { %2802 = shalt.err (!%p2799_p0)
}
  0x8c   : > { %s2803_s8 = scalar_lea.vmem %s546_s0, 128  ;;  %s2941_s9 = smov [#allocation2]  }
  0x8d   : > { %p2804_p13 = scmp.ne.s32.totalorder %s546_s0, %s2803_s8  ;;  %s2808_s25 = sshll.u32 %s2941_s9, 4  ;;  %s2809_s25 = int_to_ptr.vmem [resolvable:$false] %s2808_s25 }
  0x8e   : > { %s2810_s29 = scalar_lea.vmem %s2809_s25, 256  ;;  %p2811_p1 = scmp.lt.s32.totalorder %s546_s0, %s2809_s25 }
  0x8f   : > { %p2806_p2 = pnand %p2804_p13, %p2792_p4  ;;  %p2812_p6 = scmp.lt.s32.totalorder %s2810_s29, %s2803_s8 }
  0x91   : > { %p2807_p7 = pneg %p2806_p2  ;;  %p2813_p12 = por %p2812_p6, %p2811_p1 }
  0x93   : > { %p2814_p3 = pnand %p2813_p12, %p2807_p7 }
  0x95   : > { %2817 = shalt.err (!%p2814_p3)
}
  0x96   : > { %2487 = dma.hbm_to_vmem [thread:$0]  (!%p3201_p5), %s3198_s4, 128, %s546_s0, %s535_s26  }
  0x97   : > { %s552_s23 = sand.u32 1, %s2930_s24   ;;  %s556_s19 = scalar_lea.vmem [#allocation5], %s3192_s20 }
  0x98   : > { %s563_s17 = sshll.u32 %s556_s19, 4  ;;  %s553_s30 = scalar_lea.sflag [#allocation6], %s552_s23  ;;  %s564_s17 = int_to_ptr.vmem [resolvable:$true] %s563_s17 }
  0x99   : > { %s2818_s16 = scalar_lea.hbm %s3208_s12, 128  ;;  %s2823_s9 = scalar_lea.hbm %s3563_s1, 256 }
  0x9a   : > { %p2819_p2 = scmp.ne.s32.totalorder %s3208_s12, %s2818_s16  ;;  %p2824_p6 = scmp.lt.s32.totalorder %s3208_s12, %s3563_s1 }
  0x9b   : > { %p2825_p8 = scmp.lt.s32.totalorder %s2823_s9, %s2818_s16 }
  0x9c   : > { %p2821_p3 = pnand %p2819_p2, %p2792_p4 }
  0x9d   : > { %p2826_p9 = por %p2825_p8, %p2824_p6 }
  0x9e   : > { %p2822_p12 = pneg %p2821_p3 }
  0xa0   : > { %p2827_p10 = pnand %p2826_p9, %p2822_p12 }
  0xa2   : > { %2830 = shalt.err (!%p2827_p10)
}
  0xa3   : > { %s2831_s4 = scalar_lea.vmem %s564_s17, 128  ;;  %s2942_s20 = smov [#allocation5]  }
  0xa4   : > { %p2832_p11 = scmp.ne.s32.totalorder %s564_s17, %s2831_s4  ;;  %s2836_s0 = sshll.u32 %s2942_s20, 4  ;;  %s2837_s0 = int_to_ptr.vmem [resolvable:$false] %s2836_s0 }
  0xa5   : > { %s2838_s26 = scalar_lea.vmem %s2837_s0, 256  ;;  %p2839_p7 = scmp.lt.s32.totalorder %s564_s17, %s2837_s0 }
  0xa6   : > { %p2834_p0 = pnand %p2832_p11, %p2792_p4  ;;  %p2840_p1 = scmp.lt.s32.totalorder %s2838_s26, %s2831_s4 }
  0xa8   : > { %p2835_p13 = pneg %p2834_p0  ;;  %p2841_p2 = por %p2840_p1, %p2839_p7 }
  0xaa   : > { %p2842_p3 = pnand %p2841_p2, %p2835_p13 }
  0xac   : > { %2845 = shalt.err (!%p2842_p3)
}
  0xad   : > { %2490 = dma.hbm_to_vmem [thread:$0]  (!%p3201_p5), %s3208_s12, 128, %s564_s17, %s553_s30  }
  0xae   : > { %p3625_p12 = scmp.ne.s32.totalorder %s3604_s28, 0 }
  0xaf   : > { %s3253_s23 = sand.u32 (!%p3625_p12), 1, %s2922_s22   ;;  %p3626_p4 = scmp.ne.s32.totalorder (!%p3625_p12), %s3619_s2, 0 }
  0xb0   : > { %572 = sbr.rel (%p3625_p12) target bundleno = 3644 (0xe3c), region = 84  ;;  %s3256_s19 = sshll.u32 (!%p3625_p12), %s3253_s23, 3 }
  0xb1   : > { %s575_s16 = scalar_lea.sflag (!%p3625_p12), [#allocation3], %s3253_s23  ;;  %s578_s6 = scalar_lea.vmem (!%p3625_p12), [#allocation2], %s3256_s19 }
  0xb5   : > { %2889 = dma.done.wait (%p3626_p4), %s575_s16, 128  }
  0xb6   : > { %2891 = vsyncadd (%p3626_p4), %s575_s16, 4294967168  ;;  %s583_s7 = sand.u32 1, %s3060_s27   ;;  %s587_s28 = scalar_lea.vmem [#allocation5], %s3256_s19 }
  0xb7   : > { %s584_s12 = scalar_lea.sflag [#allocation6], %s583_s7 }
  0xb8   : > { %2893 = dma.done.wait (%p3626_p4), %s584_s12, 128  }
  0xb9   : > { %2895 = vsyncadd (%p3626_p4), %s584_s12, 4294967168  ;;  %p3627_p5 = scmp.eq.s32.totalorder %s3060_s27, 0 }
  0xbb   : > { %2897 = dma.done.wait (%p3627_p5), [#allocation6], 256   ;;  %p3628_p6 = pmov %p3627_p5 }
  0xbc   : > { %p3629_p8 = pmov %p3627_p5 }
  0xbd   : > { %2899 = vsyncadd (%p3628_p6), [#allocation6], 4294967040 }
  0xbe   : > { %2901 = dma.done.wait (%p3629_p8), [#allocation9], 272   ;;  %p3630_p9 = pmov %p3627_p5 }
  0xbf   : > { %p3631_p10 = pmov %p3627_p5 }
  0xc0   : > { %2903 = vsyncadd (%p3630_p9), [#allocation9], 4294967024 }
  0xc1   : > { %2905 = dma.done.wait (%p3631_p10), [#allocation12], 272   ;;  %p3632_p11 = pmov %p3627_p5 }
  0xc2   : > { %p3633_p0 = pmov %p3627_p5 }
  0xc3   : > { %2907 = vsyncadd (%p3632_p11), [#allocation12], 4294967024 }
  0xc4   : > { %2909 = dma.done.wait (%p3633_p0), [#allocation15], 272   ;;  %p3634_p13 = pmov %p3633_p0 }
  0xc5   : > { %v2943_v0 = vmov 0.0   ;;  %vm2944_vm0 = vmmov 0   ;;  %v2562_v1 = vld [vmem:[#allocation7 + $0x8] sm:$0xff]   ;;  %v2563_v2 = vld [vmem:[#allocation7] sm:$0xff]   ;;  %vm695_vm1 = vcmask 261120   ;;  %s2945_s30 = smov 104   ;;  %v944_v23 = vlaneseq }
  0xc6   : > { %2911 = vsyncadd (%p3634_p13), [#allocation15], 4294967024  ;;  %2292 = vmatprep.subr.bf16.mxu0 %v2943_v0  ;;  %2296 = vmatprep.mubr.msk.bf16.mxu0 %vm2944_vm0, %v2943_v0  ;;  %v3292_v3 = vld [vmem:[%s578_s6] sm:$0xff]  ;;  %s2946_s8 = smov 120   ;;  %s2947_s9 = smov 96   ;;  %vm749_vm2 = vcmask 64512  }
  0xc7   : > { %2300 = vmatprep.subr.bf16.mxu1 %v2943_v0  ;;  %2302 = vmatprep.mubr.msk.bf16.mxu1 %vm2944_vm0, %v2943_v0  ;;  %v671_v4 = vpack.c.bf16 %v3292_v3, %v3292_v3  ;;  %v2201_v5 = vld [vmem:[%s3565_s3] ss:$0 sm:$0xff]  ;;  %s2948_s25 = smov 112   ;;  %v945_v24 = vshrl.u32 %v944_v23, 7  ;;  %v947_v25 = vand.u32 127, %v944_v23  ;;  %s2949_s29 = smov 64  }
  0xc8   : > { %2293 = vmatpush3.bf16.msra.mxu0 %v2562_v1  ;;  %vm1008_vm4 = vcmask 1043456   ;;  %s2950_s4 = smov 8   ;;  %s2951_s20 = smov 16   ;;  %vm1209_vm5 = vcmask 130048   ;;  %vm1211_vm6 = vcmask 195584  }
  0xc9   : > { %2294 = vmatprep.subr.bf16.mxu0 %v2943_v0  ;;  %vm948_vm3 = vcmp.ge.s32.totalorder %v945_v24, %v947_v25  ;;  %s2952_s0 = smov 24   ;;  %s668_s26 = scalar_lea.vmem [#allocation17], %s3256_s19 }
  0xca   : > { %s2017_s16 = sshll.u32 %s668_s26, 4  ;;  %s3636_s12 = sld [smem:[#allocation38_spill]]  ;;  %s2018_s16 = int_to_ptr.vmem [resolvable:$true] %s2017_s16 }
  0xcb   : > { %s2846_s17 = scalar_lea.vmem %s2018_s16, 128  ;;  %p3637_p1 = scmp.ne.s32.totalorder %s3620_s15, 0 }
  0xcc   : > { %2295 = vmatpush3.bf16.msra.mxu0 %v2563_v2  ;;  %p2847_p7 = scmp.ne.s32.totalorder %s2018_s16, %s2846_s17 }
  0xcd   : > { %2306 = vmatprep.subr.bf16.mxu0 %v2943_v0 }
  0xce   : > { %p2848_p2 = pnand %p2847_p7, %p3637_p1 }
  0xcf   : > { %2297 = vmatmul.mubr.msk.bf16.vlgmr.msra.gmra.mxu0 %vm695_vm1, %v671_v4 }
  0xd0   : > { %2308 = vmatprep.mubr.msk.bf16.mxu0 %vm2944_vm0, %v2943_v0  ;;  %p2849_p3 = pneg %p2848_p2 }
 0x18f   : > { %v733_v6 = vpop.f32.mrf.mxu0 }
 0x190   : > { %v734_v7 = vadd.f32 %v2201_v5, %v733_v6 }
 0x191   : > { %v2298_v8 = vpop.f32.mrf.mxu0 }
 0x192   : > { %v3304_v9 = vpack.c.bf16 %v734_v7, %v734_v7 }
 0x193   : > { %v736_v10 = vpop.f32.mrf.mxu0 }
 0x194   : > { %745 = vrot.lane.b32.xlu1 %v3304_v9, %s2945_s30  ;;  %741 = vrot.lane.b32.xlu0 %v3304_v9, %s2946_s8 }
 0x195   : > { %v2299_v11 = vpop.f32.mrf.mxu0 }
 0x198   : > { %747 = vrot.lane.b32.xlu1 %v3304_v9, %s2947_s9  ;;  %743 = vrot.lane.b32.xlu0 %v3304_v9, %s2948_s25 }
 0x206   : > { %v3314_v12 = vpop.permute.xlu1 %745  ;;  %v3316_v13 = vpop.permute.xlu0 %741 }
 0x207   : > { %796 = vrot.lane.b32.xlu0 %v3316_v13, %s2947_s9 }
 0x20a   : > { %v748_v14 = vpop.permute.xlu1 %747  ;;  %v3320_v15 = vpop.permute.xlu0 %743 }
 0x20b   : > { %892 = vrot.lane.b32.xlu0 %v3314_v12, %s2947_s9  ;;  %844 = vrot.lane.b32.xlu1 %v3320_v15, %s2947_s9  ;;  %v754_v16 = vsel %vm749_vm2, %v748_v14, 0 }
 0x20c   : > { %2301 = vmatpush3.bf16.xpose.msra.mxu1 %v754_v16 }
 0x20d   : > { %2312 = vmatprep.subr.bf16.mxu1 %v2943_v0 }
 0x213   : > { %2303 = vmatmul.mubr.msk.bf16.vlgmr.msra.gmra.mxu1 %vm749_vm2, %v3304_v9 }
 0x214   : > { %2314 = vmatprep.mubr.msk.bf16.mxu1 %vm2944_vm0, %v2943_v0 }
 0x279   : > { %v797_v17 = vpop.permute.xlu0 %796 }
 0x27a   : > { %v802_v18 = vsel %vm749_vm2, %v797_v17, 0 }
 0x27b   : > { %2307 = vmatpush3.bf16.xpose.msra.mxu0 %v802_v18 }
 0x27c   : > { %2318 = vmatprep.subr.bf16.mxu0 %v2943_v0 }
 0x27d   : > { %v845_v19 = vpop.permute.xlu1 %844  ;;  %v893_v21 = vpop.permute.xlu0 %892 }
 0x27e   : > { %v850_v20 = vsel %vm749_vm2, %v845_v19, 0  ;;  %v898_v22 = vsel %vm749_vm2, %v893_v21, 0 }
 0x27f   : > { %2313 = vmatpush3.bf16.xpose.msra.mxu1 %v850_v20 }
 0x280   : > { %2324 = vmatprep.subr.bf16.mxu1 %v2943_v0 }
 0x282   : > { %2309 = vmatmul.mubr.msk.bf16.vlgmr.msra.gmra.mxu0 %vm749_vm2, %v3316_v13 }
 0x283   : > { %2319 = vmatpush3.bf16.xpose.msra.mxu0 %v898_v22  ;;  %2320 = vmatprep.mubr.msk.bf16.mxu0 %vm2944_vm0, %v2943_v0 }
 0x284   : > { %2330 = vmatprep.subr.bf16.mxu0 %v2943_v0 }
 0x286   : > { %2315 = vmatmul.mubr.msk.bf16.vlgmr.msra.gmra.mxu1 %vm749_vm2, %v3320_v15 }
 0x287   : > { %2326 = vmatprep.mubr.msk.bf16.mxu1 %vm2944_vm0, %v2943_v0 }
 0x28a   : > { %2321 = vmatmul.mubr.msk.bf16.vlgmr.msra.gmra.mxu0 %vm749_vm2, %v3314_v12 }
 0x28b   : > { %2332 = vmatprep.mubr.msk.bf16.mxu0 %vm2944_vm0, %v2943_v0 }
 0x2d3   : > { %v790_v26 = vpop.f32.mrf.mxu1 }
 0x2d4   : > { %v940_v27 = vmul.f32 0.35355338, %v790_v26 }
 0x2d5   : > { %v2304_v28 = vpop.f32.mrf.mxu1 }
 0x2d6   : > { %v951_v29 = vsel %vm948_vm3, %v940_v27, -1e+30 }
 0x2d7   : > { %v793_v30 = vpop.f32.mrf.mxu1  ;;  %v955_v31 = vsel %vm749_vm2, %v951_v29, -inf }
 0x2d8   : > { %956 = vmax.xlane.f32.xlu1 %v955_v31 }
 0x2d9   : > { %v2305_v32 = vpop.f32.mrf.mxu1 }
 0x342   : > { %v838_v33 = vpop.f32.mrf.mxu0 }
 0x343   : > { %v941_v34 = vmul.f32 0.35355338, %v838_v33 }
 0x344   : > { %v2310_v35 = vpop.f32.mrf.mxu0 }
 0x345   : > { %v952_v36 = vsel %vm948_vm3, %v941_v34, -1e+30 }
 0x346   : > { %v841_v37 = vpop.f32.mrf.mxu0  ;;  %v886_v38 = vpop.f32.mrf.mxu1  ;;  %v958_v39 = vsel %vm749_vm2, %v952_v36, -inf }
 0x347   : > { %v942_v40 = vmul.f32 0.35355338, %v886_v38  ;;  %959 = vmax.xlane.f32.xlu0 %v958_v39 }
 0x348   : > { %v2311_v41 = vpop.f32.mrf.mxu0  ;;  %v2316_v42 = vpop.f32.mrf.mxu1 }
 0x349   : > { %v953_v43 = vsel %vm948_vm3, %v942_v40, -1e+30  ;;  %v2564_v40 = vld [vmem:[#allocation8 + $0x8] sm:$0xff]   ;;  %v2565_v41 = vld [vmem:[#allocation8] sm:$0xff]  }
 0x34a   : > { %v889_v44 = vpop.f32.mrf.mxu1  ;;  %v934_v45 = vpop.f32.mrf.mxu0  ;;  %v961_v46 = vsel %vm749_vm2, %v953_v43, -inf }
 0x34b   : > { %v943_v47 = vmul.f32 0.35355338, %v934_v45  ;;  %962 = vmax.xlane.f32.xlu0 %v961_v46 }
 0x34c   : > { %v2317_v48 = vpop.f32.mrf.mxu1  ;;  %v2322_v49 = vpop.f32.mrf.mxu0 }
 0x34d   : > { %v954_v50 = vsel %vm948_vm3, %v943_v47, -1e+30 }
 0x34e   : > { %v937_v51 = vpop.f32.mrf.mxu0  ;;  %v964_v52 = vsel %vm749_vm2, %v954_v50, -inf }
 0x34f   : > { %965 = vmax.xlane.f32.xlu1 %v964_v52 }
 0x350   : > { %v2323_v53 = vpop.f32.mrf.mxu0 }
 0x360   : > { %1052 = vrot.lane.b32.xlu1 %v3316_v13, %s2949_s29 }
 0x361   : > { %1003 = vrot.lane.b32.xlu0 %v3304_v9, %s2949_s29  ;;  %v957_v54 = vpop.xlane.xlu1 %956 }
 0x362   : > { %v967_v55 = vsub.f32 %v951_v29, %v957_v54 }
 0x364   : > { %v971_v56 = vmul.f32 1.442695, %v967_v55 }
 0x366   : > { %2572 = vpow2.f32 %v971_v56 }
 0x373   : > { %v2573_v57 = vpop.eup %2572 }
 0x374   : > { %v979_v58 = vsel %vm749_vm2, %v2573_v57, 0.0 }
 0x380   : > { %980 = vadd.xlane.f32.xlu0 %v979_v58 }
 0x3d0   : > { %v960_v59 = vpop.xlane.xlu0 %959 }
 0x3d1   : > { %v968_v60 = vsub.f32 %v952_v36, %v960_v59 }
 0x3d3   : > { %v973_v61 = vmul.f32 1.442695, %v968_v60 }
 0x3d4   : > { %v963_v62 = vpop.xlane.xlu0 %962 }
 0x3d5   : > { %2574 = vpow2.f32 %v973_v61  ;;  %v969_v63 = vsub.f32 %v953_v43, %v963_v62  ;;  %v2213_v61 = vld [vmem:[%s3567_s5] ss:$0 sm:$0xff] }
 0x3d7   : > { %v975_v1 = vmul.f32 1.442695, %v969_v63 }
 0x3d8   : > { %v1004_v2 = vpop.permute.xlu0 %1003  ;;  %v966_v4 = vpop.xlane.xlu1 %965 }
 0x3d9   : > { %2576 = vpow2.f32 %v975_v1  ;;  %v1010_v5 = vsel %vm1008_vm4, %v1004_v2, 0  ;;  %v970_v6 = vsub.f32 %v954_v50, %v966_v4 }
 0x3da   : > { %2325 = vmatpush3.bf16.msra.mxu1 %v1010_v5 }
 0x3db   : > { %v977_v7 = vmul.f32 1.442695, %v970_v6  ;;  %2336 = vmatprep.subr.bf16.mxu1 %v2943_v0 }
 0x3dc   : > { %v1053_v8 = vpop.permute.xlu1 %1052 }
 0x3dd   : > { %2578 = vpow2.f32 %v977_v7  ;;  %v1058_v9 = vsel %vm1008_vm4, %v1053_v8, 0 }
 0x3de   : > { %2331 = vmatpush3.bf16.msra.mxu0 %v1058_v9 }
 0x3df   : > { %2342 = vmatprep.subr.bf16.mxu0 %v2943_v0 }
 0x3e2   : > { %v2575_v10 = vpop.eup %2574 }
 0x3e3   : > { %v982_v11 = vsel %vm749_vm2, %v2575_v10, 0.0 }
 0x3e4   : > { %983 = vadd.xlane.f32.xlu1 %v982_v11 }
 0x3e6   : > { %v2577_v13 = vpop.eup %2576 }
 0x3e7   : > { %v985_v14 = vsel %vm749_vm2, %v2577_v13, 0.0 }
 0x3e8   : > { %986 = vadd.xlane.f32.xlu0 %v985_v14  ;;  %v2567_v14 = vld [vmem:[#allocation13 + $0x8] sm:$0xff]  }
 0x3ea   : > { %v2579_v16 = vpop.eup %2578 }
 0x3eb   : > { %v988_v17 = vsel %vm749_vm2, %v2579_v16, 0.0 }
 0x3ec   : > { %989 = vadd.xlane.f32.xlu1 %v988_v17  ;;  %v1311_v17 = vld [vmem:[%s587_s28] sm:$0xff]  ;;  %s2004_s28 = scalar_lea.sflag [#allocation4], %s3253_s23 }
 0x3fd   : > { %1100 = vrot.lane.b32.xlu1 %v3320_v15, %s2949_s29 }
 0x3fe   : > { %1148 = vrot.lane.b32.xlu0 %v3314_v12, %s2949_s29 }
 0x409   : > { %v981_v18 = vpop.xlane.xlu0 %980 }
 0x40a   : > { %2580 = vrcp.f32 %v981_v18  ;;  %v1312_v18 = vpack.c.bf16 %v1311_v17, %v1311_v17 }
 0x417   : > { %v2581_v19 = vpop.eup %2580 }
 0x418   : > { %v995_v20 = vmul.f32 %v2581_v19, %v2573_v57 }
 0x41a   : > { %v999_v21 = vpack.c.bf16 %v995_v20, %v995_v20 }
 0x41c   : > { %2327 = vmatmul.mubr.msk.bf16.vlgmr.msra.gmra.mxu1 %vm749_vm2, %v999_v21 }
 0x41d   : > { %2338 = vmatprep.mubr.msk.bf16.mxu1 %vm2944_vm0, %v2943_v0 }
 0x46d   : > { %v984_v22 = vpop.xlane.xlu1 %983 }
 0x46e   : > { %2582 = vrcp.f32 %v984_v22 }
 0x471   : > { %v987_v23 = vpop.xlane.xlu0 %986 }
 0x472   : > { %2584 = vrcp.f32 %v987_v23  ;;  %v2217_v23 = vld [vmem:[#allocation10] ss:$0 sm:$0xff] }
 0x475   : > { %v990_v24 = vpop.xlane.xlu1 %989  ;;  %v1149_v27 = vpop.permute.xlu0 %1148 }
 0x476   : > { %2586 = vrcp.f32 %v990_v24  ;;  %v1154_v30 = vsel %vm1008_vm4, %v1149_v27, 0 }
 0x479   : > { %v1101_v15 = vpop.permute.xlu1 %1100 }
 0x47a   : > { %v1106_v25 = vsel %vm1008_vm4, %v1101_v15, 0  ;;  %v2218_v15 = vld [vmem:[#allocation11] ss:$0 sm:$0xff] }
 0x47b   : > { %v2583_v12 = vpop.eup %2582  ;;  %2337 = vmatpush3.bf16.msra.mxu1 %v1106_v25 }
 0x47c   : > { %v996_v26 = vmul.f32 %v2583_v12, %v2575_v10  ;;  %2348 = vmatprep.subr.bf16.mxu1 %v2943_v0 }
 0x47e   : > { %v1000_v28 = vpack.c.bf16 %v996_v26, %v996_v26 }
 0x47f   : > { %v2585_v29 = vpop.eup %2584 }
 0x480   : > { %2333 = vmatmul.mubr.msk.bf16.vlgmr.msra.gmra.mxu0 %vm749_vm2, %v1000_v28  ;;  %v997_v31 = vmul.f32 %v2585_v29, %v2577_v13  ;;  %v2566_v13 = vld [vmem:[%s3572_s10 + $0x8] sm:$0xff]  }
 0x481   : > { %2343 = vmatpush3.bf16.msra.mxu0 %v1154_v30  ;;  %2344 = vmatprep.mubr.msk.bf16.mxu0 %vm2944_vm0, %v2943_v0 }
 0x482   : > { %v1001_v32 = vpack.c.bf16 %v997_v31, %v997_v31  ;;  %2356 = vmatprep.subr.bf16.mxu0 %v2943_v0  ;;  %v2223_v31 = vld [vmem:[%s3573_s11] ss:$0 sm:$0xff] }
 0x483   : > { %v2587_v33 = vpop.eup %2586 }
 0x484   : > { %2339 = vmatmul.mubr.msk.bf16.vlgmr.msra.gmra.mxu1 %vm749_vm2, %v1001_v32  ;;  %v998_v34 = vmul.f32 %v2587_v33, %v2579_v16  ;;  %v2569_v16 = vld [vmem:[#allocation13] sm:$0xff]   ;;  %v2219_v32 = vld [vmem:[#allocation14] ss:$0 sm:$0xff] }
 0x485   : > { %2352 = vmatprep.mubr.msk.bf16.mxu1 %vm2944_vm0, %v2943_v0  ;;  %2349 = vmatpush3.bf16.msra.mxu1 %v2564_v40 }
 0x486   : > { %v1002_v35 = vpack.c.bf16 %v998_v34, %v998_v34  ;;  %2350 = vmatprep.subr.bf16.mxu1 %v2943_v0 }
 0x488   : > { %2345 = vmatmul.mubr.msk.bf16.vlgmr.msra.gmra.mxu0 %vm749_vm2, %v1002_v35 }
 0x489   : > { %2360 = vmatprep.mubr.msk.bf16.mxu0 %vm2944_vm0, %v2943_v0  ;;  %2351 = vmatpush3.bf16.msra.mxu1 %v2565_v41 }
 0x48a   : > { %2364 = vmatprep.subr.bf16.mxu1 %v2943_v0  ;;  %2357 = vmatpush3.bf16.msra.mxu0 %v2567_v14 }
 0x48b   : > { %2358 = vmatprep.subr.bf16.mxu0 %v2943_v0 }
 0x48e   : > { %2359 = vmatpush3.bf16.msra.mxu0 %v2569_v16 }
 0x48f   : > { %2372 = vmatprep.subr.bf16.mxu0 %v2943_v0 }
 0x491   : > { %2361 = vmatmul.mubr.msk.bf16.vlgmr.msra.gmra.mxu0 %vm695_vm1, %v1312_v18 }
 0x492   : > { %2374 = vmatprep.mubr.msk.bf16.mxu0 %vm2944_vm0, %v2943_v0 }
 0x4dc   : > { %v1046_v36 = vpop.f32.mrf.mxu1 }
 0x4de   : > { %v2328_v37 = vpop.f32.mrf.mxu1 }
 0x4e0   : > { %v1049_v38 = vpop.f32.mrf.mxu1 }
 0x4e2   : > { %v2329_v39 = vpop.f32.mrf.mxu1 }
 0x540   : > { %v1094_v42 = vpop.f32.mrf.mxu0 }
 0x541   : > { %1197 = vrot.lane.b32.xlu1 %v1094_v42, %s2950_s4 }
 0x542   : > { %v2334_v43 = vpop.f32.mrf.mxu0 }
 0x544   : > { %v1097_v44 = vpop.f32.mrf.mxu0  ;;  %v1142_v45 = vpop.f32.mrf.mxu1 }
 0x545   : > { %1201 = vrot.lane.b32.xlu0 %v1142_v45, %s2951_s20 }
 0x546   : > { %v2335_v46 = vpop.f32.mrf.mxu0  ;;  %v2340_v47 = vpop.f32.mrf.mxu1 }
 0x548   : > { %v1145_v48 = vpop.f32.mrf.mxu1  ;;  %v1190_v49 = vpop.f32.mrf.mxu0 }
 0x549   : > { %1205 = vrot.lane.b32.xlu1 %v1190_v49, %s2952_s0 }
 0x54a   : > { %v2341_v50 = vpop.f32.mrf.mxu1  ;;  %v2346_v51 = vpop.f32.mrf.mxu0 }
 0x54c   : > { %v1193_v52 = vpop.f32.mrf.mxu0 }
 0x54e   : > { %v2347_v53 = vpop.f32.mrf.mxu0 }
 0x551   : > { %v1374_v27 = vpop.f32.mrf.mxu0 }
 0x552   : > { %v1375_v35 = vadd.f32 %v2219_v32, %v1374_v27 }
 0x553   : > { %v2362_v28 = vpop.f32.mrf.mxu0 }
 0x554   : > { %v1446_v39 = vpack.c.bf16 %v1375_v35, %v1375_v35 }
 0x555   : > { %v1377_v29 = vpop.f32.mrf.mxu0 }
 0x557   : > { %v2363_v30 = vpop.f32.mrf.mxu0 }
 0x5b3   : > { %v1198_v54 = vpop.permute.xlu1 %1197 }
 0x5b4   : > { %v1208_v56 = vsel %vm749_vm2, %v1046_v36, %v1198_v54 }
 0x5b7   : > { %v1202_v55 = vpop.permute.xlu0 %1201 }
 0x5b8   : > { %v1210_v57 = vsel %vm1209_vm5, %v1208_v56, %v1202_v55 }
 0x5bb   : > { %v1206_v58 = vpop.permute.xlu1 %1205 }
 0x5bc   : > { %v1212_v59 = vsel %vm1211_vm6, %v1210_v57, %v1206_v58 }
 0x5bd   : > { %v1213_v60 = vpack.c.bf16 %v1212_v59, %v1212_v59 }
 0x5bf   : > { %2353 = vmatmul.mubr.msk.bf16.vlgmr.msra.gmra.mxu1 %vm695_vm1, %v1213_v60 }
 0x5c0   : > { %2368 = vmatprep.mubr.msk.bf16.mxu1 %vm2944_vm0, %v2943_v0  ;;  %2365 = vmatpush3.bf16.msra.mxu1 %v2566_v13 }
 0x5c1   : > { %2366 = vmatprep.subr.bf16.mxu1 %v2943_v0 }
 0x67f   : > { %v1274_v62 = vpop.f32.mrf.mxu1 }
 0x680   : > { %v3404_v63 = vadd.f32 %v2213_v61, %v1274_v62 }
 0x681   : > { %v2354_v1 = vpop.f32.mrf.mxu1 }
 0x682   : > { %v1280_v2 = vadd.f32 %v3404_v63, %v3292_v3  ;;  %v2568_v3 = vld [vmem:[%s3572_s10] sm:$0xff]  }
 0x683   : > { %v1277_v4 = vpop.f32.mrf.mxu1  ;;  %2367 = vmatpush3.bf16.msra.mxu1 %v2568_v3 }
 0x684   : > { %v1283_v5 = vsel %vm695_vm1, %v1280_v2, 0.0  ;;  %2378 = vmatprep.subr.bf16.mxu1 %v2943_v0 }
 0x685   : > { %1284 = vadd.xlane.f32.xlu0 %v1283_v5  ;;  %v2355_v6 = vpop.f32.mrf.mxu1 }
 0x70e   : > { %v1285_v7 = vpop.xlane.xlu0 %1284 }
 0x70f   : > { %v1287_v8 = vmul.f32 0.03125, %v1285_v7 }
 0x711   : > { %v1288_v9 = vsub.f32 %v1280_v2, %v1287_v8 }
 0x713   : > { %v1289_v10 = vmul.f32 %v1288_v9, %v1288_v9 }
 0x715   : > { %v1290_v11 = vsel %vm695_vm1, %v1289_v10, 0.0 }
 0x716   : > { %1291 = vadd.xlane.f32.xlu1 %v1290_v11 }
 0x79f   : > { %v1292_v19 = vpop.xlane.xlu1 %1291 }
 0x7a0   : > { %v1293_v20 = vmul.f32 0.03125, %v1292_v19 }
 0x7a2   : > { %v1294_v21 = vadd.f32 1e-05, %v1293_v20 }
 0x7a4   : > { %2588 = vrsqrt.f32 %v1294_v21 }
 0x7b1   : > { %v2589_v22 = vpop.eup %2588 }
 0x7b2   : > { %v1296_v24 = vmul.f32 %v2589_v22, %v1288_v9 }
 0x7b4   : > { %v1303_v25 = vmul.f32 %v2217_v23, %v1296_v24 }
 0x7b6   : > { %v1310_v12 = vadd.f32 %v2218_v15, %v1303_v25 }
 0x7b8   : > { %v1313_v26 = vpack.c.bf16 %v1310_v12, %v1310_v12 }
 0x7ba   : > { %2369 = vmatmul.mubr.msk.bf16.vlgmr.msra.gmra.mxu1 %vm695_vm1, %v1313_v26 }
 0x7bb   : > { %2380 = vmatprep.mubr.msk.bf16.mxu1 %vm2944_vm0, %v2943_v0 }
 0x87a   : > { %v1440_v33 = vpop.f32.mrf.mxu1 }
 0x87b   : > { %v1441_v34 = vadd.f32 %v2223_v31, %v1440_v33 }
 0x87c   : > { %v2370_v36 = vpop.f32.mrf.mxu1 }
 0x87d   : > { %v3431_v37 = vpack.c.bf16 %v1441_v34, %v1441_v34 }
 0x87e   : > { %v1443_v38 = vpop.f32.mrf.mxu1 }
 0x87f   : > { %1458 = vrot.lane.b32.xlu1 %v3431_v37, %s2948_s25  ;;  %1456 = vrot.lane.b32.xlu0 %v3431_v37, %s2946_s8  ;;  %v1466_v40 = vsel %vm749_vm2, %v3431_v37, 0 }
 0x880   : > { %v2371_v41 = vpop.f32.mrf.mxu1  ;;  %2373 = vmatpush3.bf16.xpose.msra.mxu0 %v1466_v40 }
 0x881   : > { %2384 = vmatprep.subr.bf16.mxu0 %v2943_v0 }
 0x883   : > { %1460 = vrot.lane.b32.xlu1 %v3431_v37, %s2945_s30  ;;  %1448 = vrot.lane.b32.xlu0 %v1446_v39, %s2946_s8 }
 0x887   : > { %1452 = vrot.lane.b32.xlu1 %v1446_v39, %s2945_s30  ;;  %1450 = vrot.lane.b32.xlu0 %v1446_v39, %s2948_s25  ;;  %s2953_s30 = smov [#allocation17]  }
 0x888   : > { %2375 = vmatmul.mubr.msk.bf16.vlgmr.msra.gmra.mxu0 %vm749_vm2, %v1446_v39  ;;  %s2850_s8 = sshll.u32 %s2953_s30, 4  ;;  %s2851_s8 = int_to_ptr.vmem [resolvable:$false] %s2850_s8 }
 0x889   : > { %2386 = vmatprep.mubr.msk.bf16.mxu0 %vm2944_vm0, %v2943_v0  ;;  %p2853_p12 = scmp.lt.s32.totalorder %s2018_s16, %s2851_s8 }
 0x8f1   : > { %v3448_v42 = vpop.permute.xlu1 %1458  ;;  %v3450_v43 = vpop.permute.xlu0 %1456 }
 0x8f2   : > { %v1558_v44 = vsel %vm749_vm2, %v3448_v42, 0  ;;  %v1512_v45 = vsel %vm749_vm2, %v3450_v43, 0 }
 0x8f3   : > { %2379 = vmatpush3.bf16.xpose.msra.mxu1 %v1512_v45  ;;  %2385 = vmatpush3.bf16.xpose.msra.mxu0 %v1558_v44 }
 0x8f4   : > { %2390 = vmatprep.subr.bf16.mxu1 %v2943_v0  ;;  %2396 = vmatprep.subr.bf16.mxu0 %v2943_v0 }
 0x8f5   : > { %v1449_v46 = vpop.permute.xlu0 %1448  ;;  %v3458_v47 = vpop.permute.xlu1 %1460 }
 0x8f6   : > { %v1604_v49 = vsel %vm749_vm2, %v3458_v47, 0 }
 0x8f9   : > { %v1451_v48 = vpop.permute.xlu0 %1450  ;;  %v1453_v50 = vpop.permute.xlu1 %1452 }
 0x8fa   : > { %2381 = vmatmul.mubr.msk.bf16.vlgmr.msra.gmra.mxu1 %vm749_vm2, %v1449_v46  ;;  %2387 = vmatmul.mubr.msk.bf16.vlgmr.msra.gmra.mxu0 %vm749_vm2, %v1451_v48 }
 0x8fb   : > { %2391 = vmatpush3.bf16.xpose.msra.mxu1 %v1604_v49  ;;  %2392 = vmatprep.mubr.msk.bf16.mxu1 %vm2944_vm0, %v2943_v0 }
 0x8fc   : > { %2398 = vmatprep.mubr.msk.bf16.mxu0 %vm2944_vm0, %v2943_v0  ;;  %2402 = vmatprep.subr.bf16.mxu1 %v2943_v0 }
 0x902   : > { %2393 = vmatmul.mubr.msk.bf16.vlgmr.msra.gmra.mxu1 %vm749_vm2, %v1453_v50 }
 0x903   : > { %2404 = vmatprep.mubr.msk.bf16.mxu1 %vm2944_vm0, %v2943_v0 }
 0x948   : > { %v1502_v51 = vpop.f32.mrf.mxu0 }
 0x949   : > { %v1646_v52 = vmul.f32 0.35355338, %v1502_v51 }
 0x94a   : > { %v2376_v53 = vpop.f32.mrf.mxu0 }
 0x94b   : > { %v1650_v54 = vsel %vm749_vm2, %v1646_v52, -inf }
 0x94c   : > { %1651 = vmax.xlane.f32.xlu0 %v1650_v54  ;;  %v1505_v55 = vpop.f32.mrf.mxu0 }
 0x94e   : > { %v2377_v56 = vpop.f32.mrf.mxu0 }
 0x9ba   : > { %v1548_v57 = vpop.f32.mrf.mxu1  ;;  %v1594_v58 = vpop.f32.mrf.mxu0 }
 0x9bb   : > { %v1647_v59 = vmul.f32 0.35355338, %v1548_v57  ;;  %v1648_v60 = vmul.f32 0.35355338, %v1594_v58 }
 0x9bc   : > { %v2382_v61 = vpop.f32.mrf.mxu1  ;;  %v2388_v62 = vpop.f32.mrf.mxu0 }
 0x9bd   : > { %v1653_v1 = vsel %vm749_vm2, %v1647_v59, -inf  ;;  %v1656_v2 = vsel %vm749_vm2, %v1648_v60, -inf  ;;  %v2570_v61 = vld [vmem:[#allocation16 + $0x8] sm:$0xff]   ;;  %v2571_v62 = vld [vmem:[#allocation16] sm:$0xff]  }
 0x9be   : > { %1654 = vmax.xlane.f32.xlu1 %v1653_v1  ;;  %v1551_v4 = vpop.f32.mrf.mxu1  ;;  %1657 = vmax.xlane.f32.xlu0 %v1656_v2  ;;  %v1597_v5 = vpop.f32.mrf.mxu0 }
 0x9c0   : > { %v2383_v6 = vpop.f32.mrf.mxu1  ;;  %v2389_v7 = vpop.f32.mrf.mxu0 }
 0x9c2   : > { %v1640_v8 = vpop.f32.mrf.mxu1 }
 0x9c3   : > { %v1649_v9 = vmul.f32 0.35355338, %v1640_v8 }
 0x9c4   : > { %v2394_v10 = vpop.f32.mrf.mxu1 }
 0x9c5   : > { %v1659_v11 = vsel %vm749_vm2, %v1649_v9, -inf }
 0x9c6   : > { %v1643_v13 = vpop.f32.mrf.mxu1  ;;  %1660 = vmax.xlane.f32.xlu0 %v1659_v11 }
 0x9c8   : > { %v2395_v14 = vpop.f32.mrf.mxu1 }
 0x9cf   : > { %1698 = vrot.lane.b32.xlu1 %v3431_v37, %s2947_s9 }
 0x9d5   : > { %v1652_v3 = vpop.xlane.xlu0 %1651 }
 0x9d6   : > { %v1662_v16 = vsub.f32 %v1646_v52, %v1652_v3 }
 0x9d8   : > { %v1666_v17 = vmul.f32 1.442695, %v1662_v16 }
 0x9da   : > { %2590 = vpow2.f32 %v1666_v17 }
 0x9e7   : > { %v2591_v18 = vpop.eup %2590 }
 0x9e8   : > { %v1674_v19 = vsel %vm749_vm2, %v2591_v18, 0.0 }
 0x9f3   : > { %1675 = vadd.xlane.f32.xlu1 %v1674_v19 }
 0xa47   : > { %v1655_v20 = vpop.xlane.xlu1 %1654  ;;  %v1658_v21 = vpop.xlane.xlu0 %1657 }
 0xa48   : > { %v1663_v22 = vsub.f32 %v1647_v59, %v1655_v20  ;;  %v1664_v23 = vsub.f32 %v1648_v60, %v1658_v21  ;;  %v2235_v21 = vld [vmem:[%s3575_s13] ss:$0 sm:$0xff] }
 0xa4a   : > { %v1668_v24 = vmul.f32 1.442695, %v1663_v22  ;;  %v1670_v15 = vmul.f32 1.442695, %v1664_v23 }
 0xa4b   : > { %v1699_v25 = vpop.permute.xlu1 %1698 }
 0xa4c   : > { %2592 = vpow2.f32 %v1668_v24  ;;  %v1704_v12 = vsel %vm1008_vm4, %v1699_v25, 0 }
 0xa4d   : > { %2594 = vpow2.f32 %v1670_v15  ;;  %2397 = vmatpush3.bf16.msra.mxu0 %v1704_v12 }
 0xa4e   : > { %2408 = vmatprep.subr.bf16.mxu0 %v2943_v0 }
 0xa4f   : > { %v1661_v26 = vpop.xlane.xlu0 %1660 }
 0xa50   : > { %v1665_v27 = vsub.f32 %v1649_v9, %v1661_v26 }
 0xa52   : > { %v1672_v28 = vmul.f32 1.442695, %v1665_v27 }
 0xa54   : > { %2596 = vpow2.f32 %v1672_v28 }
 0xa59   : > { %v2593_v29 = vpop.eup %2592 }
 0xa5a   : > { %v2595_v30 = vpop.eup %2594  ;;  %v1677_v31 = vsel %vm749_vm2, %v2593_v29, 0.0 }
 0xa5b   : > { %1678 = vadd.xlane.f32.xlu0 %v1677_v31  ;;  %v1680_v32 = vsel %vm749_vm2, %v2595_v30, 0.0 }
 0xa5c   : > { %1681 = vadd.xlane.f32.xlu1 %v1680_v32 }
 0xa61   : > { %v2597_v33 = vpop.eup %2596 }
 0xa62   : > { %v1683_v34 = vsel %vm749_vm2, %v2597_v33, 0.0 }
 0xa63   : > { %1684 = vadd.xlane.f32.xlu0 %v1683_v34 }
 0xa6d   : > { %1794 = vrot.lane.b32.xlu1 %v3448_v42, %s2947_s9 }
 0xa71   : > { %1842 = vrot.lane.b32.xlu1 %v3458_v47, %s2947_s9 }
 0xa79   : > { %1746 = vrot.lane.b32.xlu0 %v3450_v43, %s2947_s9 }
 0xa7c   : > { %v1676_v35 = vpop.xlane.xlu1 %1675 }
 0xa7d   : > { %2598 = vrcp.f32 %v1676_v35  ;;  %v2239_v35 = vld [vmem:[%s3576_s14] ss:$0 sm:$0xff] }
 0xa8a   : > { %v2599_v36 = vpop.eup %2598 }
 0xa8b   : > { %v1690_v37 = vmul.f32 %v2599_v36, %v2591_v18 }
 0xa8d   : > { %v1694_v38 = vpack.c.bf16 %v1690_v37, %v1690_v37 }
 0xa8f   : > { %2399 = vmatmul.mubr.msk.bf16.vlgmr.msra.gmra.mxu0 %vm749_vm2, %v1694_v38 }
 0xa90   : > { %2410 = vmatprep.mubr.msk.bf16.mxu0 %vm2944_vm0, %v2943_v0 }
 0xae4   : > { %v1679_v39 = vpop.xlane.xlu0 %1678 }
 0xae5   : > { %v1682_v40 = vpop.xlane.xlu1 %1681  ;;  %2600 = vrcp.f32 %v1679_v39 }
 0xae6   : > { %2602 = vrcp.f32 %v1682_v40 }
 0xae9   : > { %v1795_v41 = vpop.permute.xlu1 %1794 }
 0xaea   : > { %v1800_v42 = vsel %vm1008_vm4, %v1795_v41, 0 }
 0xaeb   : > { %2409 = vmatpush3.bf16.msra.mxu0 %v1800_v42 }
 0xaec   : > { %v1685_v44 = vpop.xlane.xlu0 %1684  ;;  %2420 = vmatprep.subr.bf16.mxu0 %v2943_v0 }
 0xaed   : > { %2604 = vrcp.f32 %v1685_v44  ;;  %v1843_v49 = vpop.permute.xlu1 %1842 }
 0xaee   : > { %v1848_v53 = vsel %vm1008_vm4, %v1843_v49, 0 }
 0xaf0   : > { %v1747_v43 = vpop.permute.xlu0 %1746 }
 0xaf1   : > { %v1752_v45 = vsel %vm1008_vm4, %v1747_v43, 0 }
 0xaf2   : > { %v2601_v46 = vpop.eup %2600  ;;  %2403 = vmatpush3.bf16.msra.mxu1 %v1752_v45 }
 0xaf3   : > { %v2603_v47 = vpop.eup %2602  ;;  %2414 = vmatprep.subr.bf16.mxu1 %v2943_v0  ;;  %v1691_v48 = vmul.f32 %v2601_v46, %v2593_v29 }
 0xaf4   : > { %v1692_v50 = vmul.f32 %v2603_v47, %v2595_v30 }
 0xaf5   : > { %v1695_v51 = vpack.c.bf16 %v1691_v48, %v1691_v48 }
 0xaf6   : > { %v1696_v52 = vpack.c.bf16 %v1692_v50, %v1692_v50 }
 0xaf7   : > { %2405 = vmatmul.mubr.msk.bf16.vlgmr.msra.gmra.mxu1 %vm749_vm2, %v1695_v51 }
 0xaf8   : > { %2411 = vmatmul.mubr.msk.bf16.vlgmr.msra.gmra.mxu0 %vm749_vm2, %v1696_v52  ;;  %2415 = vmatpush3.bf16.msra.mxu1 %v1848_v53 }
 0xaf9   : > { %2416 = vmatprep.mubr.msk.bf16.mxu1 %vm2944_vm0, %v2943_v0  ;;  %2424 = vmatprep.mubr.msk.bf16.mxu0 %vm2944_vm0, %v2943_v0 }
 0xafa   : > { %v2605_v54 = vpop.eup %2604  ;;  %2421 = vmatpush3.bf16.msra.mxu0 %v2570_v61 }
 0xafb   : > { %v1693_v55 = vmul.f32 %v2605_v54, %v2597_v33  ;;  %2422 = vmatprep.subr.bf16.mxu0 %v2943_v0 }
 0xafd   : > { %v1697_v56 = vpack.c.bf16 %v1693_v55, %v1693_v55 }
 0xafe   : > { %2423 = vmatpush3.bf16.msra.mxu0 %v2571_v62 }
 0xaff   : > { %2417 = vmatmul.mubr.msk.bf16.vlgmr.msra.gmra.mxu1 %vm749_vm2, %v1697_v56 }
 0xb4f   : > { %v1740_v57 = vpop.f32.mrf.mxu0 }
 0xb51   : > { %v2400_v58 = vpop.f32.mrf.mxu0 }
 0xb53   : > { %v1743_v59 = vpop.f32.mrf.mxu0 }
 0xb55   : > { %v2401_v60 = vpop.f32.mrf.mxu0 }
 0xbb7   : > { %v1788_v1 = vpop.f32.mrf.mxu1 }
 0xbb8   : > { %v1836_v2 = vpop.f32.mrf.mxu0  ;;  %1891 = vrot.lane.b32.xlu0 %v1788_v1, %s2950_s4 }
 0xbb9   : > { %1895 = vrot.lane.b32.xlu1 %v1836_v2, %s2951_s20  ;;  %v2406_v4 = vpop.f32.mrf.mxu1  ;;  %s3635_s20 = sld [smem:[#allocation37_spill]] }
 0xbba   : > { %v2412_v5 = vpop.f32.mrf.mxu0 }
 0xbbb   : > { %v1791_v6 = vpop.f32.mrf.mxu1 }
 0xbbc   : > { %v1839_v7 = vpop.f32.mrf.mxu0 }
 0xbbd   : > { %v2407_v8 = vpop.f32.mrf.mxu1 }
 0xbbe   : > { %v2413_v9 = vpop.f32.mrf.mxu0 }
 0xbbf   : > { %v1884_v10 = vpop.f32.mrf.mxu1  ;;  %v2240_v37 = vld [vmem:[%s3635_s20] ss:$0 sm:$0xff] }
 0xbc0   : > { %1899 = vrot.lane.b32.xlu0 %v1884_v10, %s2952_s0  ;;  %s2242_s0 = sshll.u32 %s3060_s27, 7  ;;  %s2852_s27 = scalar_lea.vmem %s2851_s8, 256 }
 0xbc1   : > { %v2418_v11 = vpop.f32.mrf.mxu1  ;;  %s2015_s2 = scalar_lea.hbm %s3636_s12, %s2242_s0  ;;  %p2854_p4 = scmp.lt.s32.totalorder %s2852_s27, %s2846_s17 }
 0xbc3   : > { %v1887_v13 = vpop.f32.mrf.mxu1  ;;  %p2855_p5 = por %p2854_p4, %p2853_p12 }
 0xbc5   : > { %v2419_v0 = vpop.f32.mrf.mxu1  ;;  %p2856_p6 = pnand %p2855_p5, %p2849_p3 }
 0xc2a   : > { %v1892_v14 = vpop.permute.xlu0 %1891 }
 0xc2b   : > { %v1902_v3 = vsel %vm749_vm2, %v1740_v57, %v1892_v14  ;;  %v1896_v16 = vpop.permute.xlu1 %1895 }
 0xc2c   : > { %v1903_v17 = vsel %vm1209_vm5, %v1902_v3, %v1896_v16 }
 0xc32   : > { %v1900_v18 = vpop.permute.xlu0 %1899 }
 0xc33   : > { %v1904_v19 = vsel %vm1211_vm6, %v1903_v17, %v1900_v18 }
 0xc34   : > { %v1905_v20 = vpack.c.bf16 %v1904_v19, %v1904_v19 }
 0xc36   : > { %2425 = vmatmul.mubr.msk.bf16.vlgmr.msra.gmra.mxu0 %vm695_vm1, %v1905_v20 }
 0xcf6   : > { %v1966_v22 = vpop.f32.mrf.mxu0 }
 0xcf7   : > { %v1967_v23 = vadd.f32 %v2235_v21, %v1966_v22 }
 0xcf8   : > { %v2426_v24 = vpop.f32.mrf.mxu0 }
 0xcf9   : > { %v1972_v15 = vadd.f32 %v1967_v23, %v3404_v63 }
 0xcfa   : > { %v1969_v25 = vpop.f32.mrf.mxu0 }
 0xcfb   : > { %v1975_v12 = vsel %vm695_vm1, %v1972_v15, 0.0 }
 0xcfc   : > { %1976 = vadd.xlane.f32.xlu1 %v1975_v12  ;;  %v2427_v26 = vpop.f32.mrf.mxu0 }
 0xd85   : > { %v1977_v27 = vpop.xlane.xlu1 %1976 }
 0xd86   : > { %v1978_v28 = vmul.f32 0.03125, %v1977_v27 }
 0xd88   : > { %v1979_v29 = vsub.f32 %v1972_v15, %v1978_v28 }
 0xd8a   : > { %v1980_v30 = vmul.f32 %v1979_v29, %v1979_v29 }
 0xd8c   : > { %v1981_v31 = vsel %vm695_vm1, %v1980_v30, 0.0 }
 0xd8d   : > { %1982 = vadd.xlane.f32.xlu0 %v1981_v31 }
 0xe16   : > { %v1983_v32 = vpop.xlane.xlu0 %1982 }
 0xe17   : > { %v1984_v33 = vmul.f32 0.03125, %v1983_v32 }
 0xe19   : > { %v1985_v34 = vadd.f32 1e-05, %v1984_v33 }
 0xe1b   : > { %2606 = vrsqrt.f32 %v1985_v34 }
 0xe28   : > { %v2607_v63 = vpop.eup %2606 }
 0xe29   : > { %v1987_v36 = vmul.f32 %v2607_v63, %v1979_v29 }
 0xe2b   : > { %v1994_v38 = vmul.f32 %v2239_v35, %v1987_v36 }
 0xe2d   : > { %v2001_v39 = vadd.f32 %v2240_v37, %v1994_v38 }
 0xe2f   : > { %2002 = vst.msk [vmem:[%s668_s26] sm:$0xff] %vm695_vm1, %v2001_v39 }
 0xe30   : > { %2859 = shalt.err (!%p2856_p6)
}
 0xe31   : > { %s2860_s19 = scalar_lea.hbm %s2015_s2, 128  ;;  %s2864_s25 = scalar_lea.hbm %s3636_s12, 256 }
 0xe32   : > { %p2861_p8 = scmp.ne.s32.totalorder %s2015_s2, %s2860_s19  ;;  %p2865_p11 = scmp.lt.s32.totalorder %s2015_s2, %s3636_s12 }
 0xe33   : > { %p2866_p0 = scmp.lt.s32.totalorder %s2864_s25, %s2860_s19 }
 0xe34   : > { %p2862_p9 = pnand %p2861_p8, %p3637_p1 }
 0xe35   : > { %p2867_p13 = por %p2866_p0, %p2865_p11 }
 0xe36   : > { %p2863_p10 = pneg %p2862_p9 }
 0xe38   : > { %p2868_p7 = pnand %p2867_p13, %p2863_p10 }
 0xe3a   : > { %2871 = shalt.err (!%p2868_p7)
}
 0xe3b   : > { %2460 = dma.vmem_to_hbm [thread:$0]  (%p3637_p1), %s2018_s16, 128, %s2015_s2, %s2004_s28  }
 0xe3c PF: > { %s3638_s20 = sld [smem:[#allocation28_spill]]  ;;  %s2029_s0 = sand.u32 1, %s2918_s21  }
 0xe3d   : > { %p3640_p3 = scmp.ge.s32.totalorder %s2930_s24, 2  ;;  %s2030_s26 = scalar_lea.sflag [#allocation4], %s2029_s0 }
 0xe42   : > { %p3639_p2 = scmp.ne.s32.totalorder %s3638_s20, 0 }
 0xe44   : > { %p2492_p12 = pnand %p3640_p3, %p3639_p2 }
 0xe46   : > { %p2493_p4 = pneg %p2492_p12 }
 0xe48   : > { %2913 = dma.done.wait (%p2493_p4), %s2030_s26, 128  }
 0xe49   : > { %2915 = vsyncadd (%p2493_p4), %s2030_s26, 4294967168  ;;  %s3641_s24 = sld [smem:[#allocation26_spill]]  ;;  %s3644_s21 = smov %s2922_s22 }
 0xe4a   : > { %s3642_s6 = sld [smem:[#allocation25_spill]] }
 0xe4b   : > { %s3643_s23 = sld [smem:[#allocation27_spill]] }
 0xe4f   : > { %p35_p5 = scmp.ge.s32.totalorder %s3641_s24, 4  }
 0xe50   : > { %s3645_s22 = smov %s3642_s6 }
 0xe51   :  { %37 = sbr.rel (!%p35_p5) target bundleno = 21 (0x15), region = 170 }
 0xe56   :  { %2035 = vsyncpa [#allocation3], 1 }
 0xe57   :  { %2037 = vsyncpa [#allocation3 + $0x1], 1 }
 0xe58   :  { %2038 = vsyncpa [#allocation6], 1 }
 0xe59   :  { %2040 = vsyncpa [#allocation6 + $0x1], 1 }
 0xe5a   :  { %2041 = vsyncpa [#allocation9], 1 }
 0xe5b   :  { %2042 = vsyncpa [#allocation12], 1 }
 0xe5c   :  { %2043 = vsyncpa [#allocation15], 1 }
 0xe5d   :  { %2044 = vsyncpa [#allocation4], 1 }
 0xe5e   :  { %2046 = vsyncpa [#allocation4 + $0x1], 1 }

</bundles_post_ra>
